<compile_context>
chip_gen: v7x
topology: tpu7x:2x2x1
jax: 0.10.0
libtpu: 0.0.40
codegen_flags: <defaults>
</compile_context>

<pallas_src>
import functools

import numpy as np
import jax
import jax.numpy as jnp
from jax.experimental import pallas as pl
from jax.experimental.pallas import tpu as pltpu

_BN_EPS = 1e-5
_LEAKY_SLOPE = 0.2


def _leaky(v):
    return jnp.where(v > 0, v, _LEAKY_SLOPE * v)


def _cdiv(a, b):
    return -(-a // b)


# ----------------------------------------------------------------------------
# Static ConvTranspose1d geometry.
#   y[l] = sum_{i,k : i*stride + k - padding = l} x[i] * w[k]
# Output positions are grouped by phase r = l mod stride; every phase is a
# stride-1 correlation over shifted windows of the zero-padded input.  All
# phases share a common set of Tc shifted windows, so the whole transpose conv
# becomes Tc accumulating matmuls against phase-packed (Cin, stride*Cout)
# weight slabs; the packed result interleaves to the true output.
# ----------------------------------------------------------------------------
def _tap_structure(K, s, p):
    qmin = (0 - p) // s
    qmax = (K - 1 - p) // s
    G = qmax - qmin                      # symmetric zero pad of the input
    phases = []
    for r in range(s):
        taps = [k for k in range(K) if (k - p) % s == r]
        if taps:
            b0 = (taps[0] - p) // s - qmin
            d0 = G - b0 - (len(taps) - 1)
        else:
            d0 = 0
        phases.append((taps, d0))
    ne = [(d0, len(t)) for (t, d0) in phases if t]
    d_min = min(d for d, _ in ne)
    Tc = max(d + T for d, T in ne) - d_min
    return dict(K=K, s=s, p=p, G=G, phases=phases, d_min=d_min, Tc=Tc,
                off=-qmin * s)


def _convt_geometry(L, K, s, p):
    g = dict(_tap_structure(K, s, p))
    g.update(Lin=L, Lp=L + 2 * g["G"], Mb=L + g["G"],
             L2=(L - 1) * s + K - 2 * p)
    return g


# ----------------------------------------------------------------------------
# In-kernel (trace-time) helper: one ConvTranspose over a batch tile.
#   xs_bf : list of B (L, Cin) bf16 activations (one per sample in the tile)
#   w_ref : (Tc, Cin, Dout) bf16 VMEM ref of phase-packed per-window slabs
# Returns the flat (Mtot, Dout) f32 accumulator; sample b's packed accumulator
# rows live at [b*Lp, b*Lp + Mb).  Per-sample padded spans never overlap, so
# flattening the batch into M is exact.
# ----------------------------------------------------------------------------
def _convt_batched(xs_bf, w_ref, geo):
    B = len(xs_bf)
    _, cin = xs_bf[0].shape
    G, Lp, d_min, Tc = geo["G"], geo["Lp"], geo["d_min"], geo["Tc"]
    if G > 0:
        zg = jnp.zeros((G, cin), jnp.bfloat16)
        z2 = jnp.zeros((2 * G, cin), jnp.bfloat16)
        pieces = [zg]
        for i, xb in enumerate(xs_bf):
            pieces.append(xb)
            pieces.append(z2 if i + 1 < B else zg)
        xp = jnp.concatenate(pieces, axis=0)          # (B*Lp, Cin) bf16
    else:
        xp = xs_bf[0] if B == 1 else jnp.concatenate(xs_bf, axis=0)
    m_tot = B * Lp - d_min - (Tc - 1)
    acc = None
    for j in range(Tc):                               # per-tap accumulation
        win = xp[d_min + j: d_min + j + m_tot, :]
        part = jnp.dot(win, w_ref[j], preferred_element_type=jnp.float32)
        acc = part if acc is None else acc + part
    return acc


# ----------------------------------------------------------------------------
# Fused whole-layer kernel: trace-time loop over all blocks; the batch-tile
# activation stays in VMEM/vregs between blocks.
# ----------------------------------------------------------------------------
def _layer_kernel(*refs, metas):
    x_ref, o_ref = refs[0], refs[-1]
    wrefs = refs[1:-1]
    B = x_ref.shape[0]
    ys = [x_ref[b] for b in range(B)]                 # (L0, Cin0) f32 each
    wi = 0
    nb = len(metas)
    for bi, m in enumerate(metas):
        w1, b1, w2 = wrefs[wi], wrefs[wi + 1], wrefs[wi + 2]
        wi += 3
        wsc = None
        if m["has_proj"]:
            wsc = wrefs[wi]
            wi += 1
        bout = wrefs[wi]
        wi += 1
        g1, g2 = m["geo1"], m["geo2"]
        is_last = bi == nb - 1

        xs_bf = [y.astype(jnp.bfloat16) for y in ys]

        # conv1 (3,1,1) + folded BN + LeakyReLU, batched over the tile.
        a1 = _leaky(_convt_batched(xs_bf, w1, g1) + b1[...])
        Lp1, off1, L1 = g1["Lp"], g1["off"], g1["L2"]
        hs_bf = [a1[b * Lp1 + off1: b * Lp1 + off1 + L1, :]
                 .astype(jnp.bfloat16) for b in range(B)]

        # conv2 + folded BN (+ projection shortcut accumulated into it).
        a2 = _convt_batched(hs_bf, w2, g2)
        if m["has_proj"]:
            a2 = a2 + _convt_batched(xs_bf, wsc, g2)
        Lp2, off2, L2, Mb2, s = (g2["Lp"], g2["off"], g2["L2"],
                                 g2["Mb"], g2["s"])
        bo = bout[...]

        if is_last and s > 1:
            # Lane-dense packed output (Mb, s*Cout); phase interleave + crop is
            # one cheap XLA reshape/slice on the final output in the wrapper.
            for b in range(B):
                o_ref[b] = _leaky(a2[b * Lp2: b * Lp2 + Mb2, :] + bo
                                  ).astype(o_ref.dtype)
        else:
            nys = []
            for b in range(B):
                ob = a2[b * Lp2 + off2: b * Lp2 + off2 + L2, :] + bo
                if not m["has_proj"]:
                    ob = ob + ys[b]                   # identity shortcut (f32)
                ob = _leaky(ob)
                if is_last:
                    o_ref[b] = ob.astype(o_ref.dtype)
                else:
                    nys.append(ob)
            ys = nys


def _const_map(ndim):
    def imap(i):
        return (0,) * ndim
    return imap


def _choose_batch_tile(N, L):
    # Flatten enough batch into the matmul M dim to approach ~256 rows, but
    # keep >= 2 grid steps when N allows (so both v7x TensorCores get work).
    bt = max(1, min(N, _cdiv(256, max(L, 1))))
    if N >= 2:
        bt = min(bt, _cdiv(N, 2))
    return bt


def resnet_transpose_layer_forward(blocks, x):
    """x: (N, C_in, L) exactly like the PyTorch module; returns (N, C_out, L_out)."""
    N, c0, L0 = x.shape
    for blk in blocks[:-1]:
        assert blk["s"] == 1, "only the last block may be strided"

    # Per-block geometry for this L (static Python data passed to the kernel).
    metas, L = [], L0
    for blk in blocks:
        g1 = _convt_geometry(L, 3, 1, 1)
        assert g1["L2"] == L
        g2 = _convt_geometry(L, blk["K"], blk["s"], blk["p"])
        metas.append(dict(geo1=g1, geo2=g2, has_proj=blk["has_proj"]))
        L = g2["L2"]

    xcl = jnp.transpose(x, (0, 2, 1)).astype(jnp.float32)     # channels-last
    bt = _choose_batch_tile(N, L0)
    n_pad = _cdiv(N, bt) * bt
    if n_pad != N:
        xcl = jnp.concatenate(
            [xcl, jnp.zeros((n_pad - N, L0, c0), xcl.dtype)], axis=0)

    args = [xcl]
    in_specs = [pl.BlockSpec((bt, L0, c0), lambda i: (i, 0, 0))]
    for blk in blocks:
        ops = [blk["w1"], blk["b1"], blk["w2"]]
        if blk["has_proj"]:
            ops.append(blk["wsc"])
        ops.append(blk["bout"])
        for a in ops:
            args.append(a)
            in_specs.append(pl.BlockSpec(a.shape, _const_map(a.ndim)))

    last, g_last = blocks[-1], metas[-1]["geo2"]
    s_last, cout = last["s"], last["cout"]
    if s_last > 1:
        out_block = (bt, g_last["Mb"], s_last * cout)
    else:
        out_block = (bt, g_last["L2"], cout)
    out_shape = jax.ShapeDtypeStruct((n_pad,) + out_block[1:], jnp.float32)
    out_spec = pl.BlockSpec(out_block, lambda i: (i, 0, 0))

    # Advisory cost estimate (MXU flops + HBM bytes) for the XLA scheduler.
    flops = 0
    for blk, m in zip(blocks, metas):
        g1, g2 = m["geo1"], m["geo2"]
        f = 2 * g1["Mb"] * g1["Tc"] * blk["cin"] * blk["cout"]
        f += 2 * g2["Mb"] * g2["Tc"] * blk["cout"] * blk["s"] * blk["cout"]
        if blk["has_proj"]:
            f += 2 * g2["Mb"] * g2["Tc"] * blk["cin"] * blk["s"] * blk["cout"]
        flops += n_pad * f
    bytes_accessed = int(xcl.size) * 4 + int(np.prod(out_shape.shape)) * 4
    bytes_accessed += sum(int(np.prod(a.shape)) * a.dtype.itemsize
                          for a in args[1:])

    kernel = functools.partial(_layer_kernel, metas=metas)
    out = pl.pallas_call(
        kernel,
        out_shape=out_shape,
        grid=(n_pad // bt,),
        in_specs=in_specs,
        out_specs=out_spec,
        compiler_params=pltpu.CompilerParams(
            dimension_semantics=("parallel",),
            vmem_limit_bytes=32 * 1024 * 1024),
        cost_estimate=pl.CostEstimate(flops=flops, transcendentals=0,
                                      bytes_accessed=bytes_accessed),
    )(*args)

    if s_last > 1:
        out = out.reshape(n_pad, g_last["Mb"] * s_last, cout)
        out = out[:, g_last["off"]: g_last["off"] + g_last["L2"], :]
    out = out[:N]
    return jnp.transpose(out, (0, 2, 1))


# ----------------------------------------------------------------------------
# Deterministic parameters: ConvTranspose1d weights + BatchNorm1d (inference)
# folded into bf16, phase-packed per-window matmul slabs; biases pre-summed.
# Raw folded f32 tensors are kept for the plain-JAX reference check.
# ----------------------------------------------------------------------------
def _init_folded_convt_bn(key, cin, cout, K, conv_bias):
    k1, k2, k3, k4, k5, k6 = jax.random.split(key, 6)
    w = jax.random.normal(k1, (cin, cout, K), jnp.float32) / np.sqrt(cin * K)
    b = (0.05 * jax.random.normal(k2, (cout,), jnp.float32)
         if conv_bias else jnp.zeros((cout,), jnp.float32))
    gamma = 1.0 + 0.1 * jax.random.normal(k3, (cout,), jnp.float32)
    beta = 0.05 * jax.random.normal(k4, (cout,), jnp.float32)
    mean = 0.05 * jax.random.normal(k5, (cout,), jnp.float32)
    var = 1.0 + 0.1 * jax.random.uniform(k6, (cout,), jnp.float32)
    scale = gamma / jnp.sqrt(var + _BN_EPS)
    wf = w * scale[None, :, None]              # fold BN scale into the weights
    bias = scale * (b - mean) + beta           # folded BN shift (+ conv bias)
    return wf, bias


def _pack_slabs(wf, K, s, p):
    """(Cin, Cout, K) folded f32 -> (Tc, Cin, s*Cout) bf16 per-window slabs,
    phase-packed along the output columns (zeros where a phase has no tap)."""
    cin, cout, _ = wf.shape
    t = _tap_structure(K, s, p)
    wfn = np.asarray(jax.device_get(wf), np.float32)
    slabs = np.zeros((t["Tc"], cin, s * cout), np.float32)
    for r, (taps, d0) in enumerate(t["phases"]):
        T = len(taps)
        for jp in range(T):
            j = d0 - t["d_min"] + jp
            k = taps[T - 1 - jp]
            slabs[j, :, r * cout:(r + 1) * cout] = wfn[:, :, k]
    return jnp.asarray(slabs).astype(jnp.bfloat16)


def _init_block(key, cin, cout, K, s, p):
    k1, k2, k3 = jax.random.split(key, 3)
    has_proj = (cin != cout) or ((K, s, p) != (3, 1, 1))
    w1, b1 = _init_folded_convt_bn(k1, cin, cout, 3, True)
    w2, b2 = _init_folded_convt_bn(k2, cout, cout, K, True)
    blk = dict(K=K, s=s, p=p, cin=cin, cout=cout, has_proj=has_proj,
               w1_f32=w1, b1_f32=b1, w2_f32=w2, b2_f32=b2,
               w1=_pack_slabs(w1, 3, 1, 1),
               b1=jnp.reshape(b1, (1, cout)),
               w2=_pack_slabs(w2, K, s, p))
    b_out = b2
    if has_proj:
        wsc, bsc = _init_folded_convt_bn(k3, cin, cout, K, False)
        blk.update(wsc_f32=wsc, bsc_f32=bsc, wsc=_pack_slabs(wsc, K, s, p))
        b_out = b_out + bsc
    bout = jnp.reshape(b_out, (1, cout))
    blk["bout"] = jnp.tile(bout, (1, s)) if s > 1 else bout
    return blk


def init_resnet_transpose_layer(key, num_blocks, in_channels, out_channels,
                                kernel_size, stride, padding):
    # Mirrors ResNetTransposeLayer.__init__ block configuration.
    cfgs = [((in_channels if i == 0 else out_channels), out_channels, 3, 1, 1)
            for i in range(num_blocks - 1)]
    cfgs.append(((in_channels if num_blocks == 0 else out_channels),
                 out_channels, kernel_size, stride, padding))
    keys = jax.random.split(key, len(cfgs))
    return [_init_block(k, *cfg) for k, cfg in zip(keys, cfgs)]


# ----------------------------------------------------------------------------
# Plain-JAX f32 reference (scatter-add ConvTranspose) for correctness checking.
# ----------------------------------------------------------------------------
def _convt1d_ref(x, wf, bias, stride, padding):
    N, Cin, L = x.shape
    _, Cout, K = wf.shape
    Lfull = (L - 1) * stride + K
    L2 = Lfull - 2 * padding
    y = jnp.zeros((N, Cout, Lfull), jnp.float32)
    for k in range(K):
        contrib = jnp.einsum('ncl,cd->ndl', x, wf[:, :, k])
        y = y.at[:, :, k:k + (L - 1) * stride + 1:stride].add(contrib)
    return y[:, :, padding:padding + L2] + bias[None, :, None]


def _ref_block(x, blk):
    K, s, p = blk["K"], blk["s"], blk["p"]
    y1 = _leaky(_convt1d_ref(x, blk["w1_f32"], blk["b1_f32"], 1, 1))
    y2 = _convt1d_ref(y1, blk["w2_f32"], blk["b2_f32"], s, p)
    sc = (_convt1d_ref(x, blk["wsc_f32"], blk["bsc_f32"], s, p)
          if blk["has_proj"] else x)
    return _leaky(y2 + sc)


def resnet_transpose_layer_ref(blocks, x):
    y = x.astype(jnp.float32)
    for blk in blocks:
        y = _ref_block(y, blk)
    return y


# ----------------------------------------------------------------------------
if __name__ == "__main__":
    NUM_BLOCKS = 3
    IN_CH, OUT_CH = 32, 64
    KERNEL, STRIDE, PAD = 4, 2, 1
    BATCH, L = 2, 16

    key = jax.random.PRNGKey(0)
    k_params, k_x, k_x2 = jax.random.split(key, 3)
    blocks = init_resnet_transpose_layer(k_params, NUM_BLOCKS, IN_CH, OUT_CH,
                                         KERNEL, STRIDE, PAD)

    fwd = jax.jit(functools.partial(resnet_transpose_layer_forward, blocks))

    x = jax.random.normal(k_x, (BATCH, IN_CH, L), jnp.float32)
    out = jax.block_until_ready(fwd(x))
    L_out = (L - 1) * STRIDE + KERNEL - 2 * PAD   # only the last block resizes
    assert out.shape == (BATCH, OUT_CH, L_out), out.shape
    assert bool(jnp.all(jnp.isfinite(out)))

    ref = resnet_transpose_layer_ref(blocks, x)
    err = float(jnp.max(jnp.abs(out - ref)))
    assert bool(jnp.allclose(out, ref, rtol=0.1, atol=0.1)), err

    # Second config: odd batch exercises the batch-tile padding path and the
    # multi-sample-per-grid-step (batch-flattened M) path.
    x2 = jax.random.normal(k_x2, (5, IN_CH, L), jnp.float32)
    out2 = jax.block_until_ready(fwd(x2))
    assert out2.shape == (5, OUT_CH, L_out), out2.shape
    ref2 = resnet_transpose_layer_ref(blocks, x2)
    err2 = float(jnp.max(jnp.abs(out2 - ref2)))
    assert bool(jnp.allclose(out2, ref2, rtol=0.1, atol=0.1)), err2

    print("KERNEL_OK")
</pallas_src>

<mosaic_0001>
module attributes {stable_mosaic.version = 11 : i64} {
  func.func @_layer_kernel(%arg0: i32, %arg1: memref<1x16x32xf32, #tpu.memory_space<vmem>>, %arg2: memref<3x32x64xbf16, #tpu.memory_space<vmem>>, %arg3: memref<1x64xf32, #tpu.memory_space<vmem>>, %arg4: memref<3x64x64xbf16, #tpu.memory_space<vmem>>, %arg5: memref<3x32x64xbf16, #tpu.memory_space<vmem>>, %arg6: memref<1x64xf32, #tpu.memory_space<vmem>>, %arg7: memref<3x64x64xbf16, #tpu.memory_space<vmem>>, %arg8: memref<1x64xf32, #tpu.memory_space<vmem>>, %arg9: memref<3x64x64xbf16, #tpu.memory_space<vmem>>, %arg10: memref<1x64xf32, #tpu.memory_space<vmem>>, %arg11: memref<3x64x64xbf16, #tpu.memory_space<vmem>>, %arg12: memref<1x64xf32, #tpu.memory_space<vmem>>, %arg13: memref<3x64x128xbf16, #tpu.memory_space<vmem>>, %arg14: memref<3x64x128xbf16, #tpu.memory_space<vmem>>, %arg15: memref<1x128xf32, #tpu.memory_space<vmem>>, %arg16: memref<1x18x128xf32, #tpu.memory_space<vmem>>) attributes {dimension_semantics = [#tpu.dimension_semantics<parallel>], iteration_bounds = array<i64: 2>, scalar_prefetch = 0 : i64, scratch_operands = 0 : i64, tpu.core_type = #tpu.core_type<tc>, window_params = [{transform_indices = @transform_0, window_bounds = array<i64: 1, 16, 32>}, {pipeline_mode = #tpu.pipeline_mode<synchronous>, transform_indices = @transform_1, window_bounds = array<i64: 3, 32, 64>}, {pipeline_mode = #tpu.pipeline_mode<synchronous>, transform_indices = @transform_2, window_bounds = array<i64: 1, 64>}, {pipeline_mode = #tpu.pipeline_mode<synchronous>, transform_indices = @transform_3, window_bounds = array<i64: 3, 64, 64>}, {pipeline_mode = #tpu.pipeline_mode<synchronous>, transform_indices = @transform_4, window_bounds = array<i64: 3, 32, 64>}, {pipeline_mode = #tpu.pipeline_mode<synchronous>, transform_indices = @transform_5, window_bounds = array<i64: 1, 64>}, {pipeline_mode = #tpu.pipeline_mode<synchronous>, transform_indices = @transform_6, window_bounds = array<i64: 3, 64, 64>}, {pipeline_mode = #tpu.pipeline_mode<synchronous>, transform_indices = @transform_7, window_bounds = array<i64: 1, 64>}, {pipeline_mode = #tpu.pipeline_mode<synchronous>, transform_indices = @transform_8, window_bounds = array<i64: 3, 64, 64>}, {pipeline_mode = #tpu.pipeline_mode<synchronous>, transform_indices = @transform_9, window_bounds = array<i64: 1, 64>}, {pipeline_mode = #tpu.pipeline_mode<synchronous>, transform_indices = @transform_10, window_bounds = array<i64: 3, 64, 64>}, {pipeline_mode = #tpu.pipeline_mode<synchronous>, transform_indices = @transform_11, window_bounds = array<i64: 1, 64>}, {pipeline_mode = #tpu.pipeline_mode<synchronous>, transform_indices = @transform_12, window_bounds = array<i64: 3, 64, 128>}, {pipeline_mode = #tpu.pipeline_mode<synchronous>, transform_indices = @transform_13, window_bounds = array<i64: 3, 64, 128>}, {pipeline_mode = #tpu.pipeline_mode<synchronous>, transform_indices = @transform_14, window_bounds = array<i64: 1, 128>}, {transform_indices = @transform_15, window_bounds = array<i64: 1, 18, 128>}]} {
    %c0 = arith.constant 0 : index
    %c0_0 = arith.constant 0 : index
    %c0_1 = arith.constant 0 : index
    %0 = vector.load %arg1[%c0, %c0_0, %c0_1] : memref<1x16x32xf32, #tpu.memory_space<vmem>>, vector<1x16x32xf32>
    %1 = vector.shape_cast %0 : vector<1x16x32xf32> to vector<16x32xf32>
    %2 = arith.truncf %1 : vector<16x32xf32> to vector<16x32xbf16>
    %cst = arith.constant 0.000000e+00 : bf16
    %3 = vector.broadcast %cst : bf16 to vector<2x32xbf16>
    %4 = tpu.concatenate %3, %2, %3 in 0 : vector<2x32xbf16>, vector<16x32xbf16>, vector<2x32xbf16> -> vector<20x32xbf16>
    %5 = vector.extract_strided_slice %4 {offsets = [0, 0], sizes = [18, 32], strides = [1, 1]} : vector<20x32xbf16> to vector<18x32xbf16>
    %c0_2 = arith.constant 0 : index
    %c0_3 = arith.constant 0 : index
    %c0_4 = arith.constant 0 : index
    %6 = vector.load %arg2[%c0_2, %c0_3, %c0_4] : memref<3x32x64xbf16, #tpu.memory_space<vmem>>, vector<1x32x64xbf16>
    %7 = vector.shape_cast %6 : vector<1x32x64xbf16> to vector<32x64xbf16>
    %cst_5 = arith.constant dense<0.000000e+00> : vector<18x64xf32>
    %8 = tpu.matmul %5, %7, %cst_5 {dimension_numbers = #tpu.dot_dimension_numbers<[1], [0], [0], [1], [0, 0, 1, 1], [], []>} : vector<18x32xbf16>, vector<32x64xbf16>, vector<18x64xf32> -> vector<18x64xf32>
    %9 = vector.extract_strided_slice %4 {offsets = [1, 0], sizes = [18, 32], strides = [1, 1]} : vector<20x32xbf16> to vector<18x32xbf16>
    %c1 = arith.constant 1 : index
    %c0_6 = arith.constant 0 : index
    %c0_7 = arith.constant 0 : index
    %10 = vector.load %arg2[%c1, %c0_6, %c0_7] : memref<3x32x64xbf16, #tpu.memory_space<vmem>>, vector<1x32x64xbf16>
    %11 = vector.shape_cast %10 : vector<1x32x64xbf16> to vector<32x64xbf16>
    %cst_8 = arith.constant dense<0.000000e+00> : vector<18x64xf32>
    %12 = tpu.matmul %9, %11, %cst_8 {dimension_numbers = #tpu.dot_dimension_numbers<[1], [0], [0], [1], [0, 0, 1, 1], [], []>} : vector<18x32xbf16>, vector<32x64xbf16>, vector<18x64xf32> -> vector<18x64xf32>
    %13 = arith.addf %8, %12 : vector<18x64xf32>
    %14 = vector.extract_strided_slice %4 {offsets = [2, 0], sizes = [18, 32], strides = [1, 1]} : vector<20x32xbf16> to vector<18x32xbf16>
    %c2 = arith.constant 2 : index
    %c0_9 = arith.constant 0 : index
    %c0_10 = arith.constant 0 : index
    %15 = vector.load %arg2[%c2, %c0_9, %c0_10] : memref<3x32x64xbf16, #tpu.memory_space<vmem>>, vector<1x32x64xbf16>
    %16 = vector.shape_cast %15 : vector<1x32x64xbf16> to vector<32x64xbf16>
    %cst_11 = arith.constant dense<0.000000e+00> : vector<18x64xf32>
    %17 = tpu.matmul %14, %16, %cst_11 {dimension_numbers = #tpu.dot_dimension_numbers<[1], [0], [0], [1], [0, 0, 1, 1], [], []>} : vector<18x32xbf16>, vector<32x64xbf16>, vector<18x64xf32> -> vector<18x64xf32>
    %18 = arith.addf %13, %17 : vector<18x64xf32>
    %c0_12 = arith.constant 0 : index
    %c0_13 = arith.constant 0 : index
    %19 = vector.load %arg3[%c0_12, %c0_13] : memref<1x64xf32, #tpu.memory_space<vmem>>, vector<1x64xf32>
    %20 = vector.broadcast %19 : vector<1x64xf32> to vector<18x64xf32>
    %21 = arith.addf %18, %20 : vector<18x64xf32>
    %cst_14 = arith.constant 0.000000e+00 : f32
    %22 = vector.broadcast %cst_14 : f32 to vector<18x64xf32>
    %23 = arith.cmpf ogt, %21, %22 : vector<18x64xf32>
    %cst_15 = arith.constant 2.000000e-01 : f32
    %24 = vector.broadcast %cst_15 : f32 to vector<18x64xf32>
    %25 = arith.mulf %24, %21 : vector<18x64xf32>
    %26 = arith.select %23, %21, %25 : vector<18x64xi1>, vector<18x64xf32>
    %27 = vector.extract_strided_slice %26 {offsets = [1, 0], sizes = [16, 64], strides = [1, 1]} : vector<18x64xf32> to vector<16x64xf32>
    %28 = arith.truncf %27 : vector<16x64xf32> to vector<16x64xbf16>
    %cst_16 = arith.constant 0.000000e+00 : bf16
    %29 = vector.broadcast %cst_16 : bf16 to vector<2x64xbf16>
    %30 = tpu.concatenate %29, %28, %29 in 0 : vector<2x64xbf16>, vector<16x64xbf16>, vector<2x64xbf16> -> vector<20x64xbf16>
    %31 = vector.extract_strided_slice %30 {offsets = [0, 0], sizes = [18, 64], strides = [1, 1]} : vector<20x64xbf16> to vector<18x64xbf16>
    %c0_17 = arith.constant 0 : index
    %c0_18 = arith.constant 0 : index
    %c0_19 = arith.constant 0 : index
    %32 = vector.load %arg4[%c0_17, %c0_18, %c0_19] : memref<3x64x64xbf16, #tpu.memory_space<vmem>>, vector<1x64x64xbf16>
    %33 = vector.shape_cast %32 : vector<1x64x64xbf16> to vector<64x64xbf16>
    %cst_20 = arith.constant dense<0.000000e+00> : vector<18x64xf32>
    %34 = tpu.matmul %31, %33, %cst_20 {dimension_numbers = #tpu.dot_dimension_numbers<[1], [0], [0], [1], [0, 0, 1, 1], [], []>} : vector<18x64xbf16>, vector<64x64xbf16>, vector<18x64xf32> -> vector<18x64xf32>
    %35 = vector.extract_strided_slice %30 {offsets = [1, 0], sizes = [18, 64], strides = [1, 1]} : vector<20x64xbf16> to vector<18x64xbf16>
    %c1_21 = arith.constant 1 : index
    %c0_22 = arith.constant 0 : index
    %c0_23 = arith.constant 0 : index
    %36 = vector.load %arg4[%c1_21, %c0_22, %c0_23] : memref<3x64x64xbf16, #tpu.memory_space<vmem>>, vector<1x64x64xbf16>
    %37 = vector.shape_cast %36 : vector<1x64x64xbf16> to vector<64x64xbf16>
    %cst_24 = arith.constant dense<0.000000e+00> : vector<18x64xf32>
    %38 = tpu.matmul %35, %37, %cst_24 {dimension_numbers = #tpu.dot_dimension_numbers<[1], [0], [0], [1], [0, 0, 1, 1], [], []>} : vector<18x64xbf16>, vector<64x64xbf16>, vector<18x64xf32> -> vector<18x64xf32>
    %39 = arith.addf %34, %38 : vector<18x64xf32>
    %40 = vector.extract_strided_slice %30 {offsets = [2, 0], sizes = [18, 64], strides = [1, 1]} : vector<20x64xbf16> to vector<18x64xbf16>
    %c2_25 = arith.constant 2 : index
    %c0_26 = arith.constant 0 : index
    %c0_27 = arith.constant 0 : index
    %41 = vector.load %arg4[%c2_25, %c0_26, %c0_27] : memref<3x64x64xbf16, #tpu.memory_space<vmem>>, vector<1x64x64xbf16>
    %42 = vector.shape_cast %41 : vector<1x64x64xbf16> to vector<64x64xbf16>
    %cst_28 = arith.constant dense<0.000000e+00> : vector<18x64xf32>
    %43 = tpu.matmul %40, %42, %cst_28 {dimension_numbers = #tpu.dot_dimension_numbers<[1], [0], [0], [1], [0, 0, 1, 1], [], []>} : vector<18x64xbf16>, vector<64x64xbf16>, vector<18x64xf32> -> vector<18x64xf32>
    %44 = arith.addf %39, %43 : vector<18x64xf32>
    %cst_29 = arith.constant 0.000000e+00 : bf16
    %45 = vector.broadcast %cst_29 : bf16 to vector<2x32xbf16>
    %46 = tpu.concatenate %45, %2, %45 in 0 : vector<2x32xbf16>, vector<16x32xbf16>, vector<2x32xbf16> -> vector<20x32xbf16>
    %47 = vector.extract_strided_slice %46 {offsets = [0, 0], sizes = [18, 32], strides = [1, 1]} : vector<20x32xbf16> to vector<18x32xbf16>
    %c0_30 = arith.constant 0 : index
    %c0_31 = arith.constant 0 : index
    %c0_32 = arith.constant 0 : index
    %48 = vector.load %arg5[%c0_30, %c0_31, %c0_32] : memref<3x32x64xbf16, #tpu.memory_space<vmem>>, vector<1x32x64xbf16>
    %49 = vector.shape_cast %48 : vector<1x32x64xbf16> to vector<32x64xbf16>
    %cst_33 = arith.constant dense<0.000000e+00> : vector<18x64xf32>
    %50 = tpu.matmul %47, %49, %cst_33 {dimension_numbers = #tpu.dot_dimension_numbers<[1], [0], [0], [1], [0, 0, 1, 1], [], []>} : vector<18x32xbf16>, vector<32x64xbf16>, vector<18x64xf32> -> vector<18x64xf32>
    %51 = vector.extract_strided_slice %46 {offsets = [1, 0], sizes = [18, 32], strides = [1, 1]} : vector<20x32xbf16> to vector<18x32xbf16>
    %c1_34 = arith.constant 1 : index
    %c0_35 = arith.constant 0 : index
    %c0_36 = arith.constant 0 : index
    %52 = vector.load %arg5[%c1_34, %c0_35, %c0_36] : memref<3x32x64xbf16, #tpu.memory_space<vmem>>, vector<1x32x64xbf16>
    %53 = vector.shape_cast %52 : vector<1x32x64xbf16> to vector<32x64xbf16>
    %cst_37 = arith.constant dense<0.000000e+00> : vector<18x64xf32>
    %54 = tpu.matmul %51, %53, %cst_37 {dimension_numbers = #tpu.dot_dimension_numbers<[1], [0], [0], [1], [0, 0, 1, 1], [], []>} : vector<18x32xbf16>, vector<32x64xbf16>, vector<18x64xf32> -> vector<18x64xf32>
    %55 = arith.addf %50, %54 : vector<18x64xf32>
    %56 = vector.extract_strided_slice %46 {offsets = [2, 0], sizes = [18, 32], strides = [1, 1]} : vector<20x32xbf16> to vector<18x32xbf16>
    %c2_38 = arith.constant 2 : index
    %c0_39 = arith.constant 0 : index
    %c0_40 = arith.constant 0 : index
    %57 = vector.load %arg5[%c2_38, %c0_39, %c0_40] : memref<3x32x64xbf16, #tpu.memory_space<vmem>>, vector<1x32x64xbf16>
    %58 = vector.shape_cast %57 : vector<1x32x64xbf16> to vector<32x64xbf16>
    %cst_41 = arith.constant dense<0.000000e+00> : vector<18x64xf32>
    %59 = tpu.matmul %56, %58, %cst_41 {dimension_numbers = #tpu.dot_dimension_numbers<[1], [0], [0], [1], [0, 0, 1, 1], [], []>} : vector<18x32xbf16>, vector<32x64xbf16>, vector<18x64xf32> -> vector<18x64xf32>
    %60 = arith.addf %55, %59 : vector<18x64xf32>
    %61 = arith.addf %44, %60 : vector<18x64xf32>
    %c0_42 = arith.constant 0 : index
    %c0_43 = arith.constant 0 : index
    %62 = vector.load %arg6[%c0_42, %c0_43] : memref<1x64xf32, #tpu.memory_space<vmem>>, vector<1x64xf32>
    %63 = vector.extract_strided_slice %61 {offsets = [1, 0], sizes = [16, 64], strides = [1, 1]} : vector<18x64xf32> to vector<16x64xf32>
    %64 = vector.broadcast %62 : vector<1x64xf32> to vector<16x64xf32>
    %65 = arith.addf %63, %64 : vector<16x64xf32>
    %cst_44 = arith.constant 0.000000e+00 : f32
    %66 = vector.broadcast %cst_44 : f32 to vector<16x64xf32>
    %67 = arith.cmpf ogt, %65, %66 : vector<16x64xf32>
    %cst_45 = arith.constant 2.000000e-01 : f32
    %68 = vector.broadcast %cst_45 : f32 to vector<16x64xf32>
    %69 = arith.mulf %68, %65 : vector<16x64xf32>
    %70 = arith.select %67, %65, %69 : vector<16x64xi1>, vector<16x64xf32>
    %71 = arith.truncf %70 : vector<16x64xf32> to vector<16x64xbf16>
    %cst_46 = arith.constant 0.000000e+00 : bf16
    %72 = vector.broadcast %cst_46 : bf16 to vector<2x64xbf16>
    %73 = tpu.concatenate %72, %71, %72 in 0 : vector<2x64xbf16>, vector<16x64xbf16>, vector<2x64xbf16> -> vector<20x64xbf16>
    %74 = vector.extract_strided_slice %73 {offsets = [0, 0], sizes = [18, 64], strides = [1, 1]} : vector<20x64xbf16> to vector<18x64xbf16>
    %c0_47 = arith.constant 0 : index
    %c0_48 = arith.constant 0 : index
    %c0_49 = arith.constant 0 : index
    %75 = vector.load %arg7[%c0_47, %c0_48, %c0_49] : memref<3x64x64xbf16, #tpu.memory_space<vmem>>, vector<1x64x64xbf16>
    %76 = vector.shape_cast %75 : vector<1x64x64xbf16> to vector<64x64xbf16>
    %cst_50 = arith.constant dense<0.000000e+00> : vector<18x64xf32>
    %77 = tpu.matmul %74, %76, %cst_50 {dimension_numbers = #tpu.dot_dimension_numbers<[1], [0], [0], [1], [0, 0, 1, 1], [], []>} : vector<18x64xbf16>, vector<64x64xbf16>, vector<18x64xf32> -> vector<18x64xf32>
    %78 = vector.extract_strided_slice %73 {offsets = [1, 0], sizes = [18, 64], strides = [1, 1]} : vector<20x64xbf16> to vector<18x64xbf16>
    %c1_51 = arith.constant 1 : index
    %c0_52 = arith.constant 0 : index
    %c0_53 = arith.constant 0 : index
    %79 = vector.load %arg7[%c1_51, %c0_52, %c0_53] : memref<3x64x64xbf16, #tpu.memory_space<vmem>>, vector<1x64x64xbf16>
    %80 = vector.shape_cast %79 : vector<1x64x64xbf16> to vector<64x64xbf16>
    %cst_54 = arith.constant dense<0.000000e+00> : vector<18x64xf32>
    %81 = tpu.matmul %78, %80, %cst_54 {dimension_numbers = #tpu.dot_dimension_numbers<[1], [0], [0], [1], [0, 0, 1, 1], [], []>} : vector<18x64xbf16>, vector<64x64xbf16>, vector<18x64xf32> -> vector<18x64xf32>
    %82 = arith.addf %77, %81 : vector<18x64xf32>
    %83 = vector.extract_strided_slice %73 {offsets = [2, 0], sizes = [18, 64], strides = [1, 1]} : vector<20x64xbf16> to vector<18x64xbf16>
    %c2_55 = arith.constant 2 : index
    %c0_56 = arith.constant 0 : index
    %c0_57 = arith.constant 0 : index
    %84 = vector.load %arg7[%c2_55, %c0_56, %c0_57] : memref<3x64x64xbf16, #tpu.memory_space<vmem>>, vector<1x64x64xbf16>
    %85 = vector.shape_cast %84 : vector<1x64x64xbf16> to vector<64x64xbf16>
    %cst_58 = arith.constant dense<0.000000e+00> : vector<18x64xf32>
    %86 = tpu.matmul %83, %85, %cst_58 {dimension_numbers = #tpu.dot_dimension_numbers<[1], [0], [0], [1], [0, 0, 1, 1], [], []>} : vector<18x64xbf16>, vector<64x64xbf16>, vector<18x64xf32> -> vector<18x64xf32>
    %87 = arith.addf %82, %86 : vector<18x64xf32>
    %c0_59 = arith.constant 0 : index
    %c0_60 = arith.constant 0 : index
    %88 = vector.load %arg8[%c0_59, %c0_60] : memref<1x64xf32, #tpu.memory_space<vmem>>, vector<1x64xf32>
    %89 = vector.broadcast %88 : vector<1x64xf32> to vector<18x64xf32>
    %90 = arith.addf %87, %89 : vector<18x64xf32>
    %cst_61 = arith.constant 0.000000e+00 : f32
    %91 = vector.broadcast %cst_61 : f32 to vector<18x64xf32>
    %92 = arith.cmpf ogt, %90, %91 : vector<18x64xf32>
    %cst_62 = arith.constant 2.000000e-01 : f32
    %93 = vector.broadcast %cst_62 : f32 to vector<18x64xf32>
    %94 = arith.mulf %93, %90 : vector<18x64xf32>
    %95 = arith.select %92, %90, %94 : vector<18x64xi1>, vector<18x64xf32>
    %96 = vector.extract_strided_slice %95 {offsets = [1, 0], sizes = [16, 64], strides = [1, 1]} : vector<18x64xf32> to vector<16x64xf32>
    %97 = arith.truncf %96 : vector<16x64xf32> to vector<16x64xbf16>
    %cst_63 = arith.constant 0.000000e+00 : bf16
    %98 = vector.broadcast %cst_63 : bf16 to vector<2x64xbf16>
    %99 = tpu.concatenate %98, %97, %98 in 0 : vector<2x64xbf16>, vector<16x64xbf16>, vector<2x64xbf16> -> vector<20x64xbf16>
    %100 = vector.extract_strided_slice %99 {offsets = [0, 0], sizes = [18, 64], strides = [1, 1]} : vector<20x64xbf16> to vector<18x64xbf16>
    %c0_64 = arith.constant 0 : index
    %c0_65 = arith.constant 0 : index
    %c0_66 = arith.constant 0 : index
    %101 = vector.load %arg9[%c0_64, %c0_65, %c0_66] : memref<3x64x64xbf16, #tpu.memory_space<vmem>>, vector<1x64x64xbf16>
    %102 = vector.shape_cast %101 : vector<1x64x64xbf16> to vector<64x64xbf16>
    %cst_67 = arith.constant dense<0.000000e+00> : vector<18x64xf32>
    %103 = tpu.matmul %100, %102, %cst_67 {dimension_numbers = #tpu.dot_dimension_numbers<[1], [0], [0], [1], [0, 0, 1, 1], [], []>} : vector<18x64xbf16>, vector<64x64xbf16>, vector<18x64xf32> -> vector<18x64xf32>
    %104 = vector.extract_strided_slice %99 {offsets = [1, 0], sizes = [18, 64], strides = [1, 1]} : vector<20x64xbf16> to vector<18x64xbf16>
    %c1_68 = arith.constant 1 : index
    %c0_69 = arith.constant 0 : index
    %c0_70 = arith.constant 0 : index
    %105 = vector.load %arg9[%c1_68, %c0_69, %c0_70] : memref<3x64x64xbf16, #tpu.memory_space<vmem>>, vector<1x64x64xbf16>
    %106 = vector.shape_cast %105 : vector<1x64x64xbf16> to vector<64x64xbf16>
    %cst_71 = arith.constant dense<0.000000e+00> : vector<18x64xf32>
    %107 = tpu.matmul %104, %106, %cst_71 {dimension_numbers = #tpu.dot_dimension_numbers<[1], [0], [0], [1], [0, 0, 1, 1], [], []>} : vector<18x64xbf16>, vector<64x64xbf16>, vector<18x64xf32> -> vector<18x64xf32>
    %108 = arith.addf %103, %107 : vector<18x64xf32>
    %109 = vector.extract_strided_slice %99 {offsets = [2, 0], sizes = [18, 64], strides = [1, 1]} : vector<20x64xbf16> to vector<18x64xbf16>
    %c2_72 = arith.constant 2 : index
    %c0_73 = arith.constant 0 : index
    %c0_74 = arith.constant 0 : index
    %110 = vector.load %arg9[%c2_72, %c0_73, %c0_74] : memref<3x64x64xbf16, #tpu.memory_space<vmem>>, vector<1x64x64xbf16>
    %111 = vector.shape_cast %110 : vector<1x64x64xbf16> to vector<64x64xbf16>
    %cst_75 = arith.constant dense<0.000000e+00> : vector<18x64xf32>
    %112 = tpu.matmul %109, %111, %cst_75 {dimension_numbers = #tpu.dot_dimension_numbers<[1], [0], [0], [1], [0, 0, 1, 1], [], []>} : vector<18x64xbf16>, vector<64x64xbf16>, vector<18x64xf32> -> vector<18x64xf32>
    %113 = arith.addf %108, %112 : vector<18x64xf32>
    %c0_76 = arith.constant 0 : index
    %c0_77 = arith.constant 0 : index
    %114 = vector.load %arg10[%c0_76, %c0_77] : memref<1x64xf32, #tpu.memory_space<vmem>>, vector<1x64xf32>
    %115 = vector.extract_strided_slice %113 {offsets = [1, 0], sizes = [16, 64], strides = [1, 1]} : vector<18x64xf32> to vector<16x64xf32>
    %116 = vector.broadcast %114 : vector<1x64xf32> to vector<16x64xf32>
    %117 = arith.addf %115, %116 : vector<16x64xf32>
    %118 = arith.addf %117, %70 : vector<16x64xf32>
    %cst_78 = arith.constant 0.000000e+00 : f32
    %119 = vector.broadcast %cst_78 : f32 to vector<16x64xf32>
    %120 = arith.cmpf ogt, %118, %119 : vector<16x64xf32>
    %cst_79 = arith.constant 2.000000e-01 : f32
    %121 = vector.broadcast %cst_79 : f32 to vector<16x64xf32>
    %122 = arith.mulf %121, %118 : vector<16x64xf32>
    %123 = arith.select %120, %118, %122 : vector<16x64xi1>, vector<16x64xf32>
    %124 = arith.truncf %123 : vector<16x64xf32> to vector<16x64xbf16>
    %cst_80 = arith.constant 0.000000e+00 : bf16
    %125 = vector.broadcast %cst_80 : bf16 to vector<2x64xbf16>
    %126 = tpu.concatenate %125, %124, %125 in 0 : vector<2x64xbf16>, vector<16x64xbf16>, vector<2x64xbf16> -> vector<20x64xbf16>
    %127 = vector.extract_strided_slice %126 {offsets = [0, 0], sizes = [18, 64], strides = [1, 1]} : vector<20x64xbf16> to vector<18x64xbf16>
    %c0_81 = arith.constant 0 : index
    %c0_82 = arith.constant 0 : index
    %c0_83 = arith.constant 0 : index
    %128 = vector.load %arg11[%c0_81, %c0_82, %c0_83] : memref<3x64x64xbf16, #tpu.memory_space<vmem>>, vector<1x64x64xbf16>
    %129 = vector.shape_cast %128 : vector<1x64x64xbf16> to vector<64x64xbf16>
    %cst_84 = arith.constant dense<0.000000e+00> : vector<18x64xf32>
    %130 = tpu.matmul %127, %129, %cst_84 {dimension_numbers = #tpu.dot_dimension_numbers<[1], [0], [0], [1], [0, 0, 1, 1], [], []>} : vector<18x64xbf16>, vector<64x64xbf16>, vector<18x64xf32> -> vector<18x64xf32>
    %131 = vector.extract_strided_slice %126 {offsets = [1, 0], sizes = [18, 64], strides = [1, 1]} : vector<20x64xbf16> to vector<18x64xbf16>
    %c1_85 = arith.constant 1 : index
    %c0_86 = arith.constant 0 : index
    %c0_87 = arith.constant 0 : index
    %132 = vector.load %arg11[%c1_85, %c0_86, %c0_87] : memref<3x64x64xbf16, #tpu.memory_space<vmem>>, vector<1x64x64xbf16>
    %133 = vector.shape_cast %132 : vector<1x64x64xbf16> to vector<64x64xbf16>
    %cst_88 = arith.constant dense<0.000000e+00> : vector<18x64xf32>
    %134 = tpu.matmul %131, %133, %cst_88 {dimension_numbers = #tpu.dot_dimension_numbers<[1], [0], [0], [1], [0, 0, 1, 1], [], []>} : vector<18x64xbf16>, vector<64x64xbf16>, vector<18x64xf32> -> vector<18x64xf32>
    %135 = arith.addf %130, %134 : vector<18x64xf32>
    %136 = vector.extract_strided_slice %126 {offsets = [2, 0], sizes = [18, 64], strides = [1, 1]} : vector<20x64xbf16> to vector<18x64xbf16>
    %c2_89 = arith.constant 2 : index
    %c0_90 = arith.constant 0 : index
    %c0_91 = arith.constant 0 : index
    %137 = vector.load %arg11[%c2_89, %c0_90, %c0_91] : memref<3x64x64xbf16, #tpu.memory_space<vmem>>, vector<1x64x64xbf16>
    %138 = vector.shape_cast %137 : vector<1x64x64xbf16> to vector<64x64xbf16>
    %cst_92 = arith.constant dense<0.000000e+00> : vector<18x64xf32>
    %139 = tpu.matmul %136, %138, %cst_92 {dimension_numbers = #tpu.dot_dimension_numbers<[1], [0], [0], [1], [0, 0, 1, 1], [], []>} : vector<18x64xbf16>, vector<64x64xbf16>, vector<18x64xf32> -> vector<18x64xf32>
    %140 = arith.addf %135, %139 : vector<18x64xf32>
    %c0_93 = arith.constant 0 : index
    %c0_94 = arith.constant 0 : index
    %141 = vector.load %arg12[%c0_93, %c0_94] : memref<1x64xf32, #tpu.memory_space<vmem>>, vector<1x64xf32>
    %142 = vector.broadcast %141 : vector<1x64xf32> to vector<18x64xf32>
    %143 = arith.addf %140, %142 : vector<18x64xf32>
    %cst_95 = arith.constant 0.000000e+00 : f32
    %144 = vector.broadcast %cst_95 : f32 to vector<18x64xf32>
    %145 = arith.cmpf ogt, %143, %144 : vector<18x64xf32>
    %cst_96 = arith.constant 2.000000e-01 : f32
    %146 = vector.broadcast %cst_96 : f32 to vector<18x64xf32>
    %147 = arith.mulf %146, %143 : vector<18x64xf32>
    %148 = arith.select %145, %143, %147 : vector<18x64xi1>, vector<18x64xf32>
    %149 = vector.extract_strided_slice %148 {offsets = [1, 0], sizes = [16, 64], strides = [1, 1]} : vector<18x64xf32> to vector<16x64xf32>
    %150 = arith.truncf %149 : vector<16x64xf32> to vector<16x64xbf16>
    %cst_97 = arith.constant 0.000000e+00 : bf16
    %151 = vector.broadcast %cst_97 : bf16 to vector<2x64xbf16>
    %152 = tpu.concatenate %151, %150, %151 in 0 : vector<2x64xbf16>, vector<16x64xbf16>, vector<2x64xbf16> -> vector<20x64xbf16>
    %153 = vector.extract_strided_slice %152 {offsets = [0, 0], sizes = [18, 64], strides = [1, 1]} : vector<20x64xbf16> to vector<18x64xbf16>
    %c0_98 = arith.constant 0 : index
    %c0_99 = arith.constant 0 : index
    %c0_100 = arith.constant 0 : index
    %154 = vector.load %arg13[%c0_98, %c0_99, %c0_100] : memref<3x64x128xbf16, #tpu.memory_space<vmem>>, vector<1x64x128xbf16>
    %155 = vector.shape_cast %154 : vector<1x64x128xbf16> to vector<64x128xbf16>
    %cst_101 = arith.constant dense<0.000000e+00> : vector<18x128xf32>
    %156 = tpu.matmul %153, %155, %cst_101 {dimension_numbers = #tpu.dot_dimension_numbers<[1], [0], [0], [1], [0, 0, 1, 1], [], []>} : vector<18x64xbf16>, vector<64x128xbf16>, vector<18x128xf32> -> vector<18x128xf32>
    %157 = vector.extract_strided_slice %152 {offsets = [1, 0], sizes = [18, 64], strides = [1, 1]} : vector<20x64xbf16> to vector<18x64xbf16>
    %c1_102 = arith.constant 1 : index
    %c0_103 = arith.constant 0 : index
    %c0_104 = arith.constant 0 : index
    %158 = vector.load %arg13[%c1_102, %c0_103, %c0_104] : memref<3x64x128xbf16, #tpu.memory_space<vmem>>, vector<1x64x128xbf16>
    %159 = vector.shape_cast %158 : vector<1x64x128xbf16> to vector<64x128xbf16>
    %cst_105 = arith.constant dense<0.000000e+00> : vector<18x128xf32>
    %160 = tpu.matmul %157, %159, %cst_105 {dimension_numbers = #tpu.dot_dimension_numbers<[1], [0], [0], [1], [0, 0, 1, 1], [], []>} : vector<18x64xbf16>, vector<64x128xbf16>, vector<18x128xf32> -> vector<18x128xf32>
    %161 = arith.addf %156, %160 : vector<18x128xf32>
    %162 = vector.extract_strided_slice %152 {offsets = [2, 0], sizes = [18, 64], strides = [1, 1]} : vector<20x64xbf16> to vector<18x64xbf16>
    %c2_106 = arith.constant 2 : index
    %c0_107 = arith.constant 0 : index
    %c0_108 = arith.constant 0 : index
    %163 = vector.load %arg13[%c2_106, %c0_107, %c0_108] : memref<3x64x128xbf16, #tpu.memory_space<vmem>>, vector<1x64x128xbf16>
    %164 = vector.shape_cast %163 : vector<1x64x128xbf16> to vector<64x128xbf16>
    %cst_109 = arith.constant dense<0.000000e+00> : vector<18x128xf32>
    %165 = tpu.matmul %162, %164, %cst_109 {dimension_numbers = #tpu.dot_dimension_numbers<[1], [0], [0], [1], [0, 0, 1, 1], [], []>} : vector<18x64xbf16>, vector<64x128xbf16>, vector<18x128xf32> -> vector<18x128xf32>
    %166 = arith.addf %161, %165 : vector<18x128xf32>
    %cst_110 = arith.constant 0.000000e+00 : bf16
    %167 = vector.broadcast %cst_110 : bf16 to vector<2x64xbf16>
    %168 = tpu.concatenate %167, %124, %167 in 0 : vector<2x64xbf16>, vector<16x64xbf16>, vector<2x64xbf16> -> vector<20x64xbf16>
    %169 = vector.extract_strided_slice %168 {offsets = [0, 0], sizes = [18, 64], strides = [1, 1]} : vector<20x64xbf16> to vector<18x64xbf16>
    %c0_111 = arith.constant 0 : index
    %c0_112 = arith.constant 0 : index
    %c0_113 = arith.constant 0 : index
    %170 = vector.load %arg14[%c0_111, %c0_112, %c0_113] : memref<3x64x128xbf16, #tpu.memory_space<vmem>>, vector<1x64x128xbf16>
    %171 = vector.shape_cast %170 : vector<1x64x128xbf16> to vector<64x128xbf16>
    %cst_114 = arith.constant dense<0.000000e+00> : vector<18x128xf32>
    %172 = tpu.matmul %169, %171, %cst_114 {dimension_numbers = #tpu.dot_dimension_numbers<[1], [0], [0], [1], [0, 0, 1, 1], [], []>} : vector<18x64xbf16>, vector<64x128xbf16>, vector<18x128xf32> -> vector<18x128xf32>
    %173 = vector.extract_strided_slice %168 {offsets = [1, 0], sizes = [18, 64], strides = [1, 1]} : vector<20x64xbf16> to vector<18x64xbf16>
    %c1_115 = arith.constant 1 : index
    %c0_116 = arith.constant 0 : index
    %c0_117 = arith.constant 0 : index
    %174 = vector.load %arg14[%c1_115, %c0_116, %c0_117] : memref<3x64x128xbf16, #tpu.memory_space<vmem>>, vector<1x64x128xbf16>
    %175 = vector.shape_cast %174 : vector<1x64x128xbf16> to vector<64x128xbf16>
    %cst_118 = arith.constant dense<0.000000e+00> : vector<18x128xf32>
    %176 = tpu.matmul %173, %175, %cst_118 {dimension_numbers = #tpu.dot_dimension_numbers<[1], [0], [0], [1], [0, 0, 1, 1], [], []>} : vector<18x64xbf16>, vector<64x128xbf16>, vector<18x128xf32> -> vector<18x128xf32>
    %177 = arith.addf %172, %176 : vector<18x128xf32>
    %178 = vector.extract_strided_slice %168 {offsets = [2, 0], sizes = [18, 64], strides = [1, 1]} : vector<20x64xbf16> to vector<18x64xbf16>
    %c2_119 = arith.constant 2 : index
    %c0_120 = arith.constant 0 : index
    %c0_121 = arith.constant 0 : index
    %179 = vector.load %arg14[%c2_119, %c0_120, %c0_121] : memref<3x64x128xbf16, #tpu.memory_space<vmem>>, vector<1x64x128xbf16>
    %180 = vector.shape_cast %179 : vector<1x64x128xbf16> to vector<64x128xbf16>
    %cst_122 = arith.constant dense<0.000000e+00> : vector<18x128xf32>
    %181 = tpu.matmul %178, %180, %cst_122 {dimension_numbers = #tpu.dot_dimension_numbers<[1], [0], [0], [1], [0, 0, 1, 1], [], []>} : vector<18x64xbf16>, vector<64x128xbf16>, vector<18x128xf32> -> vector<18x128xf32>
    %182 = arith.addf %177, %181 : vector<18x128xf32>
    %183 = arith.addf %166, %182 : vector<18x128xf32>
    %c0_123 = arith.constant 0 : index
    %c0_124 = arith.constant 0 : index
    %184 = vector.load %arg15[%c0_123, %c0_124] : memref<1x128xf32, #tpu.memory_space<vmem>>, vector<1x128xf32>
    %185 = vector.broadcast %184 : vector<1x128xf32> to vector<18x128xf32>
    %186 = arith.addf %183, %185 : vector<18x128xf32>
    %cst_125 = arith.constant 0.000000e+00 : f32
    %187 = vector.broadcast %cst_125 : f32 to vector<18x128xf32>
    %188 = arith.cmpf ogt, %186, %187 : vector<18x128xf32>
    %cst_126 = arith.constant 2.000000e-01 : f32
    %189 = vector.broadcast %cst_126 : f32 to vector<18x128xf32>
    %190 = arith.mulf %189, %186 : vector<18x128xf32>
    %191 = arith.select %188, %186, %190 : vector<18x128xi1>, vector<18x128xf32>
    %c0_127 = arith.constant 0 : index
    %c0_128 = arith.constant 0 : index
    %c0_129 = arith.constant 0 : index
    %192 = vector.load %arg16[%c0_127, %c0_128, %c0_129] : memref<1x18x128xf32, #tpu.memory_space<vmem>>, vector<1x18x128xf32>
    %193 = vector.shape_cast %192 : vector<1x18x128xf32> to vector<18x128xf32>
    %194 = vector.shape_cast %191 : vector<18x128xf32> to vector<1x18x128xf32>
    tpu.vector_store %arg16[%c0_127, %c0_128, %c0_129], %194 {strides = array<i32>} : memref<1x18x128xf32, #tpu.memory_space<vmem>>, vector<1x18x128xf32>,
    return
  }
  func.func @transform_0(%arg0: i32) -> (i32, i32, i32) {
    %c0_i32 = arith.constant 0 : i32
    %c0_i32_0 = arith.constant 0 : i32
    %c0_i32_1 = arith.constant 0 : i32
    return %arg0, %c0_i32, %c0_i32_0 : i32, i32, i32
  }
  func.func @transform_1(%arg0: i32) -> (i32, i32, i32) {
    %c0_i32 = arith.constant 0 : i32
    %c0_i32_0 = arith.constant 0 : i32
    %c0_i32_1 = arith.constant 0 : i32
    %c0_i32_2 = arith.constant 0 : i32
    return %c0_i32, %c0_i32_0, %c0_i32_1 : i32, i32, i32
  }
  func.func @transform_2(%arg0: i32) -> (i32, i32) {
    %c0_i32 = arith.constant 0 : i32
    %c0_i32_0 = arith.constant 0 : i32
    %c0_i32_1 = arith.constant 0 : i32
    return %c0_i32, %c0_i32_0 : i32, i32
  }
  func.func @transform_3(%arg0: i32) -> (i32, i32, i32) {
    %c0_i32 = arith.constant 0 : i32
    %c0_i32_0 = arith.constant 0 : i32
    %c0_i32_1 = arith.constant 0 : i32
    %c0_i32_2 = arith.constant 0 : i32
    return %c0_i32, %c0_i32_0, %c0_i32_1 : i32, i32, i32
  }
  func.func @transform_4(%arg0: i32) -> (i32, i32, i32) {
    %c0_i32 = arith.constant 0 : i32
    %c0_i32_0 = arith.constant 0 : i32
    %c0_i32_1 = arith.constant 0 : i32
    %c0_i32_2 = arith.constant 0 : i32
    return %c0_i32, %c0_i32_0, %c0_i32_1 : i32, i32, i32
  }
  func.func @transform_5(%arg0: i32) -> (i32, i32) {
    %c0_i32 = arith.constant 0 : i32
    %c0_i32_0 = arith.constant 0 : i32
    %c0_i32_1 = arith.constant 0 : i32
    return %c0_i32, %c0_i32_0 : i32, i32
  }
  func.func @transform_6(%arg0: i32) -> (i32, i32, i32) {
    %c0_i32 = arith.constant 0 : i32
    %c0_i32_0 = arith.constant 0 : i32
    %c0_i32_1 = arith.constant 0 : i32
    %c0_i32_2 = arith.constant 0 : i32
    return %c0_i32, %c0_i32_0, %c0_i32_1 : i32, i32, i32
  }
  func.func @transform_7(%arg0: i32) -> (i32, i32) {
    %c0_i32 = arith.constant 0 : i32
    %c0_i32_0 = arith.constant 0 : i32
    %c0_i32_1 = arith.constant 0 : i32
    return %c0_i32, %c0_i32_0 : i32, i32
  }
  func.func @transform_8(%arg0: i32) -> (i32, i32, i32) {
    %c0_i32 = arith.constant 0 : i32
    %c0_i32_0 = arith.constant 0 : i32
    %c0_i32_1 = arith.constant 0 : i32
    %c0_i32_2 = arith.constant 0 : i32
    return %c0_i32, %c0_i32_0, %c0_i32_1 : i32, i32, i32
  }
  func.func @transform_9(%arg0: i32) -> (i32, i32) {
    %c0_i32 = arith.constant 0 : i32
    %c0_i32_0 = arith.constant 0 : i32
    %c0_i32_1 = arith.constant 0 : i32
    return %c0_i32, %c0_i32_0 : i32, i32
  }
  func.func @transform_10(%arg0: i32) -> (i32, i32, i32) {
    %c0_i32 = arith.constant 0 : i32
    %c0_i32_0 = arith.constant 0 : i32
    %c0_i32_1 = arith.constant 0 : i32
    %c0_i32_2 = arith.constant 0 : i32
    return %c0_i32, %c0_i32_0, %c0_i32_1 : i32, i32, i32
  }
  func.func @transform_11(%arg0: i32) -> (i32, i32) {
    %c0_i32 = arith.constant 0 : i32
    %c0_i32_0 = arith.constant 0 : i32
    %c0_i32_1 = arith.constant 0 : i32
    return %c0_i32, %c0_i32_0 : i32, i32
  }
  func.func @transform_12(%arg0: i32) -> (i32, i32, i32) {
    %c0_i32 = arith.constant 0 : i32
    %c0_i32_0 = arith.constant 0 : i32
    %c0_i32_1 = arith.constant 0 : i32
    %c0_i32_2 = arith.constant 0 : i32
    return %c0_i32, %c0_i32_0, %c0_i32_1 : i32, i32, i32
  }
  func.func @transform_13(%arg0: i32) -> (i32, i32, i32) {
    %c0_i32 = arith.constant 0 : i32
    %c0_i32_0 = arith.constant 0 : i32
    %c0_i32_1 = arith.constant 0 : i32
    %c0_i32_2 = arith.constant 0 : i32
    return %c0_i32, %c0_i32_0, %c0_i32_1 : i32, i32, i32
  }
  func.func @transform_14(%arg0: i32) -> (i32, i32) {
    %c0_i32 = arith.constant 0 : i32
    %c0_i32_0 = arith.constant 0 : i32
    %c0_i32_1 = arith.constant 0 : i32
    return %c0_i32, %c0_i32_0 : i32, i32
  }
  func.func @transform_15(%arg0: i32) -> (i32, i32, i32) {
    %c0_i32 = arith.constant 0 : i32
    %c0_i32_0 = arith.constant 0 : i32
    %c0_i32_1 = arith.constant 0 : i32
    return %arg0, %c0_i32, %c0_i32_0 : i32, i32, i32
  }
}

</mosaic_0001>

<bundles_post_ra>
// kernel: resnet_transpose_layer_forward.1
= control target key start
LH: loop header
LB: loop body
LE: loop exit
PB: predicated region body
PF: predicated region fallthrough
CT: control target
= control target key end

     0   :  { %s4702_s0 = inlined_call_operand.hbm [shape: f32[2,16,32], index: 0, kind: input, shape index: {}]   ;;  %s4703_s1 = inlined_call_operand.hbm [shape: bf16[3,32,64], index: 1, kind: input, shape index: {}]   ;;  %s4704_s2 = inlined_call_operand.vmem [shape: f32[1,64], index: 2, kind: input, shape index: {}]   ;;  %s4705_s3 = inlined_call_operand.hbm [shape: bf16[3,64,64], index: 3, kind: input, shape index: {}]   ;;  %s4706_s4 = inlined_call_operand.vmem [shape: bf16[3,32,64], index: 4, kind: input, shape index: {}]   ;;  %s4707_s5 = inlined_call_operand.vmem [shape: f32[1,64], index: 5, kind: input, shape index: {}]   ;;  %s4708_s6 = inlined_call_operand.hbm [shape: bf16[3,64,64], index: 6, kind: input, shape index: {}]   ;;  %s4709_s7 = inlined_call_operand.vmem [shape: f32[1,64], index: 7, kind: input, shape index: {}]   ;;  %s4710_s8 = inlined_call_operand.hbm [shape: bf16[3,64,64], index: 8, kind: input, shape index: {}]   ;;  %s4711_s9 = inlined_call_operand.vmem [shape: f32[1,64], index: 9, kind: input, shape index: {}]   ;;  %s4712_s10 = inlined_call_operand.hbm [shape: bf16[3,64,64], index: 10, kind: input, shape index: {}]   ;;  %s4713_s11 = inlined_call_operand.vmem [shape: f32[1,64], index: 11, kind: input, shape index: {}]   ;;  %s4714_s12 = inlined_call_operand.hbm [shape: bf16[3,64,128], index: 12, kind: input, shape index: {}]   ;;  %s4715_s13 = inlined_call_operand.hbm [shape: bf16[3,64,128], index: 13, kind: input, shape index: {}]   ;;  %s4716_s14 = inlined_call_operand.vmem [shape: f32[1,128], index: 14, kind: input, shape index: {}]   ;;  %s4717_s15 = inlined_call_operand.vmem [shape: f32[2,18,128], index: 15, kind: output, shape index: {}]  }
   0x1   :  { %4720 = sst [smem:[#allocation20_spill]] %s4703_s1 }
   0x2   :  { %4721 = sst [smem:[#allocation21_spill]] %s4704_s2 }
   0x3   :  { %4722 = sst [smem:[#allocation22_spill]] %s4707_s5 }
   0x4   :  { %4723 = sst [smem:[#allocation23_spill]] %s4709_s7 }
   0x5   :  { %4724 = sst [smem:[#allocation24_spill]] %s4711_s9 }
   0x6   :  { %4725 = sst [smem:[#allocation25_spill]] %s4713_s11 }
   0x7   :  { %4726 = sst [smem:[#allocation26_spill]] %s4716_s14 }
   0x8   :  { %4727 = sst [smem:[#allocation27_spill]] %s4717_s15 }
   0x9   :  { %20 = vsyncpa [#allocation3], 0 }
   0xa   :  { %22 = vsyncpa [#allocation3 + $0x1], 0 }
   0xb   :  { %23 = vsyncpa [#allocation5], 0 }
   0xc   :  { %24 = vsyncpa [#allocation8], 0 }
   0xd   :  { %25 = vsyncpa [#allocation11], 0 }
   0xe   :  { %26 = vsyncpa [#allocation14], 0  ;;  %s4183_s18 = smov 0   ;;  %s4185_s19 = smov 0  }
   0xf   :  { %s4187_s20 = smov 0   ;;  %s4189_s21 = smov 0  }
  0x10 LB: > { %s4091_s22 = smov [#allocation4]   ;;  %s4204_s24 = sadd.s32 4294967295, %s4089_s21   ;;  %s4089_s21 = sphi %s4189_s21, %s4754_s21   ;;  %s4085_s20 = sphi %s4187_s20, %s4753_s20   ;;  %s4081_s19 = sphi %s4185_s19, %s4752_s19   ;;  %s4077_s18 = sphi %s4183_s18, %s4751_s18  }
  0x11   : > { %s395_s23 = sshll.u32 %s4091_s22, 4  ;;  %p3047_p0 = scmp.ge.s32.totalorder %s4089_s21, 1  ;;  %s4209_s23 = int_to_ptr.vmem [resolvable:$true] %s395_s23 }
  0x12   : > { %p4718_p1 = scmp.eq.s32.totalorder %s4204_s24, 0  ;;  %p383_p2 = scmp.lt.s32.totalorder %s4089_s21, 3 }
  0x13   : > { %s4092_s26 = smov [#allocation7]   ;;  %s4093_s29 = smov [#allocation10]  }
  0x14   : > { %p4211_p3 = pnand %p3047_p0, %p383_p2  ;;  %s430_s27 = sshll.u32 %s4092_s26, 4  ;;  %s4223_s27 = int_to_ptr.vmem [resolvable:$true] %s430_s27 }
  0x15   : > { %s462_s30 = sshll.u32 %s4093_s29, 4  ;;  %s4730_s1 = sld [smem:[#allocation20_spill]]  ;;  %s4225_s30 = int_to_ptr.vmem [resolvable:$true] %s462_s30 }
  0x16   : > { %s4728_s25 = scalar_select %p4211_p3, 1, 0 }
  0x17   : > { %p3645_p4 = pneg %p4211_p3 }
  0x19   : > { %p4219_p5 = pnand %p3645_p4, %p4718_p1 }
  0x1b   : > { %s3813_s22 = scalar_lea.hbm %s4730_s1, 768  ;;  %p4235_p7 = pneg %p4219_p5 }
  0x1c   : > { %p3814_p6 = scmp.ne.s32.totalorder %s4730_s1, %s3813_s22  ;;  %p3820_p10 = scmp.lt.u32.totalorder %s3813_s22, %s4730_s1 }
  0x1e   : > { %p3816_p8 = pnand %p4235_p7, %p3814_p6 }
  0x20   : > { %p3817_p9 = pneg %p3816_p8 }
  0x22   : > { %p3822_p11 = pnand %p3820_p10, %p3817_p9 }
  0x24   : > { %3825 = shalt.err (!%p3822_p11)
}
  0x25   : > { %s3826_s14 = scalar_lea.vmem %s4209_s23, 768  ;;  %p3834_p2 = scmp.lt.s32.totalorder %s4209_s23, %s4209_s23 }
  0x26   : > { %p3827_p12 = scmp.ne.s32.totalorder %s4209_s23, %s3826_s14  ;;  %p3835_p4 = scmp.lt.s32.totalorder %s3826_s14, %s3826_s14 }
  0x28   : > { %p3829_p13 = pnand %p3827_p12, %p4235_p7  ;;  %p3836_p6 = por %p3835_p4, %p3834_p2 }
  0x2a   : > { %p3830_p0 = pneg %p3829_p13 }
  0x2c   : > { %p3837_p8 = pnand %p3836_p6, %p3830_p0 }
  0x2e   : > { %3840 = shalt.err (!%p3837_p8)
}
  0x2f   : > { %s4094_s15 = smov 64   ;;  %s4095_s11 = smov 4  }
  0x30   : > { %3648 = dma.hbm_to_vmem [thread:$0]  (!%p4219_p5), %s4730_s1, 768, %s4209_s23, [#allocation5], %s4094_s15, %s4094_s15, %s4095_s11  }
  0x31   : > { %s3841_s14 = scalar_lea.hbm %s4708_s6, 1536 }
  0x32   : > { %p3842_p9 = scmp.ne.s32.totalorder %s4708_s6, %s3841_s14  ;;  %p3848_p12 = scmp.lt.u32.totalorder %s3841_s14, %s4708_s6 }
  0x34   : > { %p3844_p10 = pnand %p3842_p9, %p4235_p7 }
  0x36   : > { %p3845_p11 = pneg %p3844_p10 }
  0x38   : > { %p3850_p13 = pnand %p3848_p12, %p3845_p11 }
  0x3a   : > { %3853 = shalt.err (!%p3850_p13)
}
  0x3b   : > { %s3854_s23 = scalar_lea.vmem %s4223_s27, 1536  ;;  %p3862_p6 = scmp.lt.s32.totalorder %s4223_s27, %s4223_s27 }
  0x3c   : > { %p3855_p0 = scmp.ne.s32.totalorder %s4223_s27, %s3854_s23  ;;  %p3863_p8 = scmp.lt.s32.totalorder %s3854_s23, %s3854_s23 }
  0x3e   : > { %p3857_p2 = pnand %p3855_p0, %p4235_p7  ;;  %p3864_p9 = por %p3863_p8, %p3862_p6 }
  0x40   : > { %p3858_p4 = pneg %p3857_p2 }
  0x42   : > { %p3865_p10 = pnand %p3864_p9, %p3858_p4 }
  0x44   : > { %3868 = shalt.err (!%p3865_p10)
}
  0x45   : > { %3654 = dma.hbm_to_vmem [thread:$0]  (!%p4219_p5), %s4708_s6, 1536, %s4223_s27, [#allocation8], %s4094_s15, %s4094_s15, %s4095_s11  }
  0x46   : > { %s3869_s16 = scalar_lea.hbm %s4712_s10, 1536 }
  0x47   : > { %p3870_p11 = scmp.ne.s32.totalorder %s4712_s10, %s3869_s16  ;;  %p3876_p0 = scmp.lt.u32.totalorder %s3869_s16, %s4712_s10 }
  0x49   : > { %p3872_p12 = pnand %p3870_p11, %p4235_p7 }
  0x4b   : > { %p3873_p13 = pneg %p3872_p12 }
  0x4d   : > { %p3878_p2 = pnand %p3876_p0, %p3873_p13 }
  0x4f   : > { %3881 = shalt.err (!%p3878_p2)
}
  0x50   : > { %s3882_s27 = scalar_lea.vmem %s4225_s30, 1536  ;;  %p3890_p9 = scmp.lt.s32.totalorder %s4225_s30, %s4225_s30 }
  0x51   : > { %p3883_p4 = scmp.ne.s32.totalorder %s4225_s30, %s3882_s27  ;;  %p3891_p10 = scmp.lt.s32.totalorder %s3882_s27, %s3882_s27 }
  0x53   : > { %p3885_p6 = pnand %p3883_p4, %p4235_p7  ;;  %p3892_p11 = por %p3891_p10, %p3890_p9 }
  0x55   : > { %p3886_p8 = pneg %p3885_p6 }
  0x57   : > { %p3893_p12 = pnand %p3892_p11, %p3886_p8 }
  0x59   : > { %3896 = shalt.err (!%p3893_p12)
}
  0x5a   : > { %3660 = dma.hbm_to_vmem [thread:$0]  (!%p4219_p5), %s4712_s10, 1536, %s4225_s30, [#allocation11], %s4094_s15, %s4094_s15, %s4095_s11  }
  0x5b   : > { %s4096_s5 = smov [#allocation6]   ;;  %s4097_s9 = smov [#allocation9]  }
  0x5c   : > { %s411_s7 = sshll.u32 %s4096_s5, 4  ;;  %s446_s16 = sshll.u32 %s4097_s9, 4  ;;  %s412_s7 = int_to_ptr.vmem [resolvable:$true] %s411_s7  ;;  %s447_s16 = int_to_ptr.vmem [resolvable:$true] %s446_s16 }
  0x5d   : > { %s3897_s29 = scalar_lea.hbm %s4705_s3, 1536 }
  0x5e   : > { %p3898_p13 = scmp.ne.s32.totalorder %s4705_s3, %s3897_s29  ;;  %p3904_p4 = scmp.lt.u32.totalorder %s3897_s29, %s4705_s3 }
  0x60   : > { %p3900_p0 = pnand %p3898_p13, %p4235_p7 }
  0x62   : > { %p3901_p2 = pneg %p3900_p0 }
  0x64   : > { %p3906_p6 = pnand %p3904_p4, %p3901_p2 }
  0x66   : > { %3909 = shalt.err (!%p3906_p6)
}
  0x67   : > { %s3910_s30 = scalar_lea.vmem %s412_s7, 1536  ;;  %p3918_p11 = scmp.lt.s32.totalorder %s412_s7, %s412_s7 }
  0x68   : > { %p3911_p8 = scmp.ne.s32.totalorder %s412_s7, %s3910_s30  ;;  %p3919_p12 = scmp.lt.s32.totalorder %s3910_s30, %s3910_s30 }
  0x6a   : > { %p3913_p9 = pnand %p3911_p8, %p4235_p7  ;;  %p3920_p1 = por %p3919_p12, %p3918_p11 }
  0x6c   : > { %p3914_p10 = pneg %p3913_p9 }
  0x6e   : > { %p3921_p3 = pnand %p3920_p1, %p3914_p10 }
  0x70   : > { %3924 = shalt.err (!%p3921_p3)
}
  0x71   : > { %3651 = dma.hbm_to_vmem [thread:$0]  (!%p4219_p5), %s4705_s3, 1536, %s412_s7, [#allocation5], %s4094_s15, %s4094_s15, %s4095_s11  }
  0x72   : > { %s3925_s17 = scalar_lea.hbm %s4710_s8, 1536 }
  0x73   : > { %p3926_p1 = scmp.ne.s32.totalorder %s4710_s8, %s3925_s17  ;;  %p3932_p0 = scmp.lt.u32.totalorder %s3925_s17, %s4710_s8 }
  0x75   : > { %p3928_p3 = pnand %p3926_p1, %p4235_p7 }
  0x77   : > { %p3929_p13 = pneg %p3928_p3 }
  0x79   : > { %p3934_p2 = pnand %p3932_p0, %p3929_p13 }
  0x7b   : > { %3937 = shalt.err (!%p3934_p2)
}
  0x7c   : > { %s3938_s23 = scalar_lea.vmem %s447_s16, 1536  ;;  %p3946_p9 = scmp.lt.s32.totalorder %s447_s16, %s447_s16 }
  0x7d   : > { %p3939_p4 = scmp.ne.s32.totalorder %s447_s16, %s3938_s23  ;;  %p3947_p10 = scmp.lt.s32.totalorder %s3938_s23, %s3938_s23 }
  0x7f   : > { %p3941_p6 = pnand %p3939_p4, %p4235_p7  ;;  %p3948_p11 = por %p3947_p10, %p3946_p9 }
  0x81   : > { %p3942_p8 = pneg %p3941_p6 }
  0x83   : > { %p3949_p12 = pnand %p3948_p11, %p3942_p8 }
  0x85   : > { %3952 = shalt.err (!%p3949_p12)
}
  0x86   : > { %3657 = dma.hbm_to_vmem [thread:$0]  (!%p4219_p5), %s4710_s8, 1536, %s447_s16, [#allocation8], %s4094_s15, %s4094_s15, %s4095_s11  }
  0x87   : > { %s4098_s1 = smov [#allocation12]   ;;  %s4099_s5 = smov [#allocation13]  }
  0x88   : > { %s478_s2 = sshll.u32 %s4098_s1, 4  ;;  %s491_s9 = sshll.u32 %s4099_s5, 4  ;;  %s479_s2 = int_to_ptr.vmem [resolvable:$true] %s478_s2  ;;  %s492_s9 = int_to_ptr.vmem [resolvable:$true] %s491_s9 }
  0x89   : > { %s3953_s29 = scalar_lea.hbm %s4714_s12, 1536 }
  0x8a   : > { %p3954_p1 = scmp.ne.s32.totalorder %s4714_s12, %s3953_s29  ;;  %p3960_p0 = scmp.lt.u32.totalorder %s3953_s29, %s4714_s12 }
  0x8c   : > { %p3956_p3 = pnand %p3954_p1, %p4235_p7 }
  0x8e   : > { %p3957_p13 = pneg %p3956_p3 }
  0x90   : > { %p3962_p2 = pnand %p3960_p0, %p3957_p13 }
  0x92   : > { %3965 = shalt.err (!%p3962_p2)
}
  0x93   : > { %s3966_s16 = scalar_lea.vmem %s479_s2, 1536  ;;  %p3974_p9 = scmp.lt.s32.totalorder %s479_s2, %s479_s2 }
  0x94   : > { %p3967_p4 = scmp.ne.s32.totalorder %s479_s2, %s3966_s16  ;;  %p3975_p10 = scmp.lt.s32.totalorder %s3966_s16, %s3966_s16 }
  0x96   : > { %p3969_p6 = pnand %p3967_p4, %p4235_p7  ;;  %p3976_p11 = por %p3975_p10, %p3974_p9 }
  0x98   : > { %p3970_p8 = pneg %p3969_p6 }
  0x9a   : > { %p3977_p12 = pnand %p3976_p11, %p3970_p8 }
  0x9c   : > { %3980 = shalt.err (!%p3977_p12)
}
  0x9d   : > { %3663 = dma.hbm_to_vmem [thread:$0]  (!%p4219_p5), %s4714_s12, 1536, %s479_s2, [#allocation11], %s4094_s15, %s4094_s15, %s4095_s11  }
  0x9e   : > { %s3981_s22 = scalar_lea.hbm %s4715_s13, 1536 }
  0x9f   : > { %p3982_p1 = scmp.ne.s32.totalorder %s4715_s13, %s3981_s22  ;;  %p3988_p0 = scmp.lt.u32.totalorder %s3981_s22, %s4715_s13 }
  0xa1   : > { %p3984_p3 = pnand %p3982_p1, %p4235_p7 }
  0xa3   : > { %p3985_p13 = pneg %p3984_p3 }
  0xa5   : > { %p3990_p2 = pnand %p3988_p0, %p3985_p13 }
  0xa7   : > { %3993 = shalt.err (!%p3990_p2)
}
  0xa8   : > { %s3994_s7 = scalar_lea.vmem %s492_s9, 1536  ;;  %p4002_p9 = scmp.lt.s32.totalorder %s492_s9, %s492_s9 }
  0xa9   : > { %p3995_p4 = scmp.ne.s32.totalorder %s492_s9, %s3994_s7  ;;  %p4003_p10 = scmp.lt.s32.totalorder %s3994_s7, %s3994_s7 }
  0xab   : > { %p3997_p6 = pnand %p3995_p4, %p4235_p7  ;;  %p4004_p11 = por %p4003_p10, %p4002_p9 }
  0xad   : > { %p3998_p8 = pneg %p3997_p6 }
  0xaf   : > { %p4005_p12 = pnand %p4004_p11, %p3998_p8 }
  0xb1   : > { %4008 = shalt.err (!%p4005_p12)
}
  0xb2   : > { %3666 = dma.hbm_to_vmem [thread:$0]  (!%p4219_p5), %s4715_s13, 1536, %s492_s9, [#allocation14], %s4094_s15, %s4094_s15, %s4095_s11  }
  0xb3   : > { %s4396_s28 = sadd.s32 1, %s4089_s21   ;;  %s39_s30 = sadd.s32 1, %s4085_s20 }
  0xb4   : > { %s36_s26 = ssub.s32 %s4089_s21, %s4396_s28  ;;  %p46_p1 = scmp.ne.s32.totalorder %s4085_s20, %s4081_s19 }
  0xb5   : > { %p37_p7 = scmp.eq.s32.totalorder %s36_s26, 0  ;;  %p47_p3 = scmp.eq.s32.totalorder %s4089_s21, 0 }
  0xb6   : > { %p52_p13 = scmp.ne.s32.totalorder %s4081_s19, %s4077_s18  ;;  %p4732_p2 = scmp.eq.s32.totalorder %s4204_s24, 0 }
  0xb7   : > { %s4407_s1 = scalar_select %p37_p7, %s4085_s20, %s39_s30  }
  0xb8   : > { %p48_p0 = por %p47_p3, %p46_p1  ;;  %p4411_p4 = por %p4732_p2, %p52_p13 }
  0xb9   : > { %p3678_p6 = scmp.lt.s32.totalorder %s4089_s21, 2  ;;  %s508_s17 = sand.u32 1, %s4085_s20  }
  0xba   : > { %s3056_s15 = sshll.u32 %s508_s17, 4  ;;  %s3217_s11 = sshll.u32 %s4089_s21, 8 }
  0xbb   : > { %s4421_s29 = scalar_lea.hbm %s4702_s0, %s3217_s11  ;;  %s512_s18 = scalar_lea.vmem [#allocation2], %s3056_s15 }
  0xbc   : > { %s519_s14 = sshll.u32 %s512_s18, 4  ;;  %p4425_p5 = pnand %p3678_p6, %p48_p0  ;;  %s4423_s14 = int_to_ptr.vmem [resolvable:$true] %s519_s14 }
  0xbd   : > { %s4429_s21 = scalar_lea.sflag [#allocation3], %s508_s17  ;;  %s4009_s23 = scalar_lea.hbm %s4421_s29, 256 }
  0xbe   : > { %p4010_p8 = scmp.ne.s32.totalorder %s4421_s29, %s4009_s23  ;;  %p4011_p9 = pneg %p4425_p5 }
  0xbf   : > { %s4014_s16 = scalar_lea.hbm %s4702_s0, 512  ;;  %p4015_p12 = scmp.lt.u32.totalorder %s4421_s29, %s4702_s0 }
  0xc0   : > { %p4012_p10 = pnand %p4011_p9, %p4010_p8  ;;  %p4016_p7 = scmp.lt.u32.totalorder %s4014_s16, %s4009_s23 }
  0xc1   : > { %p4018_p3 = scmp.lt.u32.totalorder %s4009_s23, %s4421_s29 }
  0xc2   : > { %p4013_p11 = pneg %p4012_p10  ;;  %p4017_p1 = por %p4016_p7, %p4015_p12 }
  0xc4   : > { %p4019_p13 = por %p4018_p3, %p4017_p1 }
  0xc6   : > { %p4020_p0 = pnand %p4019_p13, %p4013_p11 }
  0xc8   : > { %4023 = shalt.err (!%p4020_p0)
}
  0xc9   : > { %s4024_s17 = scalar_lea.vmem %s4423_s14, 256  ;;  %s4100_s15 = smov [#allocation2]  }
  0xca   : > { %p4025_p2 = scmp.ne.s32.totalorder %s4423_s14, %s4024_s17  ;;  %s4029_s11 = sshll.u32 %s4100_s15, 4  ;;  %s4030_s11 = int_to_ptr.vmem [resolvable:$false] %s4029_s11 }
  0xcb   : > { %s4031_s9 = scalar_lea.vmem %s4030_s11, 512  ;;  %p4032_p10 = scmp.lt.s32.totalorder %s4423_s14, %s4030_s11 }
  0xcc   : > { %p4027_p6 = pnand %p4025_p2, %p4011_p9  ;;  %p4033_p12 = scmp.lt.s32.totalorder %s4031_s9, %s4024_s17 }
  0xce   : > { %p4028_p8 = pneg %p4027_p6  ;;  %p4034_p7 = por %p4033_p12, %p4032_p10 }
  0xd0   : > { %p4035_p1 = pnand %p4034_p7, %p4028_p8 }
  0xd2   : > { %4038 = shalt.err (!%p4035_p1)
}
  0xd3   : > { %s4101_s22 = smov 128   ;;  %s4102_s18 = smov 8  }
  0xd4   : > { %3670 = dma.hbm_to_vmem [thread:$0]  (!%p4425_p5), %s4421_s29, 256, %s4423_s14, %s4429_s21, %s4101_s22, %s4101_s22, %s4102_s18  }
  0xd5   : > { %p4735_p9 = scmp.ne.s32.totalorder %s4728_s25, 0 }
  0xd6   : > { %s533_s23 = sand.u32 (!%p4735_p9), 1, %s4081_s19  }
  0xd7   : > { %531 = sbr.rel (%p4735_p9) target bundleno = 1791 (0x6ff), region = 80  ;;  %s3060_s7 = sshll.u32 (!%p4735_p9), %s533_s23, 4 }
  0xd8   : > { %s534_s2 = scalar_lea.sflag (!%p4735_p9), [#allocation3], %s533_s23  ;;  %s537_s16 = scalar_lea.vmem (!%p4735_p9), [#allocation2], %s3060_s7 }
  0xde   : > { %4056 = dma.done.wait (%p4411_p4), %s534_s2, 256  }
  0xdf   : > { %4058 = vsyncadd (%p4411_p4), %s534_s2, 4294967040  ;;  %p4736_p11 = scmp.eq.s32.totalorder %s4204_s24, 0 }
  0xe1   : > { %4060 = dma.done.wait (%p4736_p11), [#allocation5], 2304   ;;  %p4737_p3 = pmov %p4736_p11 }
  0xe3   : > { %4062 = vsyncadd (%p4737_p3), [#allocation5], 4294964992  ;;  %p4738_p5 = pmov %p4737_p3 }
  0xe4   : > { %p4739_p13 = pmov %p4737_p3 }
  0xe5   : > { %4064 = dma.done.wait (%p4738_p5), [#allocation8], 3072  }
  0xe6   : > { %4066 = vsyncadd (%p4739_p13), [#allocation8], 4294964224  ;;  %p4740_p0 = pmov %p4737_p3 }
  0xe8   : > { %4068 = dma.done.wait (%p4740_p0), [#allocation11], 3072   ;;  %p4741_p2 = pmov %p4740_p0 }
  0xe9   : > { %p4742_p4 = pmov %p4740_p0 }
  0xea   : > { %4070 = vsyncadd (%p4741_p2), [#allocation11], 4294964224 }
  0xeb   : > { %4072 = dma.done.wait (%p4742_p4), [#allocation14], 1536   ;;  %p4743_p6 = pmov %p4740_p0 }
  0xec   : > { %v3729_v0 = vld [vmem:[#allocation4 + $0x10] sm:$0xff]   ;;  %v3730_v1 = vld [vmem:[#allocation4 + $0x18] sm:$0xff]   ;;  %vm637_vm0 = vsmask.f32 7424  ;;  %v3731_v5 = vld [vmem:[#allocation4 + $0x20] sm:$0xff]   ;;  %vm623_vm1 = vcmask 1040384  }
  0xed   : > { %4074 = vsyncadd (%p4743_p6), [#allocation14], 4294965760  ;;  %3350 = vmatprep.subr.bf16.mxu1 %v3729_v0  ;;  %v618_v2 = vld [vmem:[%s537_s16] sm:$0xff]  ;;  %v619_v3 = vld [vmem:[%s537_s16 + $0x8] sm:$0xff]  ;;  %3366 = vmatprep.subr.bf16.mxu0 %v3731_v5  ;;  %vm663_vm2 = vcmask 261120   ;;  %vm789_vm3 = vcmask 1046528  }
  0xee   : > { %3351 = vmatpush3.bf16.msra.mxu1 %v3729_v0  ;;  %v620_v4 = vpack.c.bf16 %v619_v3, %v618_v2  ;;  %v3732_v6 = vld [vmem:[#allocation4] sm:$0xff]   ;;  %v3733_v8 = vld [vmem:[#allocation4 + $0x28] sm:$0xff]   ;;  %3367 = vmatpush3.bf16.msra.mxu0 %v3731_v5  ;;  %v3735_v24 = vld [vmem:[#allocation6] sm:$0xff]   ;;  %s4744_s27 = sld [smem:[#allocation21_spill]]  ;;  %vm883_vm7 = vsmask.f32 256 }
  0xef   : > { %3352 = vmatprep.subr.bf16.mxu1 %v3730_v1  ;;  %3368 = vmatprep.subr.bf16.mxu0 %v3733_v8  ;;  %v3734_v22 = vld [vmem:[#allocation4 + $0x8] sm:$0xff]   ;;  %v3736_v25 = vld [vmem:[#allocation6 + $0x8] sm:$0xff]   ;;  %v3737_v26 = vld [vmem:[#allocation6 + $0x20] sm:$0xff]   ;;  %vm953_vm8 = vcmask 523264   ;;  %s4745_s16 = sld [smem:[#allocation22_spill]]  ;;  %s4746_s29 = sld [smem:[#allocation23_spill]] }
  0xf0   : > { %v622_v7 = vrot.slane %v620_v4, 7  ;;  %v3738_v27 = vld [vmem:[#allocation6 + $0x10] sm:$0xff]   ;;  %v3739_v28 = vld [vmem:[#allocation6 + $0x28] sm:$0xff]   ;;  %v3740_v29 = vld [vmem:[#allocation6 + $0x18] sm:$0xff]   ;;  %s4747_s21 = sld [smem:[#allocation24_spill]]  ;;  %s4748_s17 = sld [smem:[#allocation25_spill]] }
  0xf1   : > { %v3741_v30 = vld [vmem:[#allocation6 + $0x30] sm:$0xff]   ;;  %v3743_v31 = vld [vmem:[%s4706_s4 + $0x10] sm:$0xff]   ;;  %v3742_v32 = vld [vmem:[#allocation6 + $0x38] sm:$0xff]   ;;  %p612_p8 = scmp.lt.s32.totalorder %s4204_s24, 1  ;;  %s4749_s9 = sld [smem:[#allocation26_spill]] }
  0xf2   : > { %3353 = vmatpush3.bf16.msra.mxu1 %v3730_v1  ;;  %v4481_v9 = vsel %vm623_vm1, 0, %v622_v7  ;;  %v4484_v10 = vsel %vm623_vm1, %v622_v7, 0  ;;  %3369 = vmatpush3.bf16.msra.mxu0 %v3733_v8  ;;  %v4518_v33 = vld [vmem:[#allocation6 + $0x40] sm:$0xff]   ;;  %s4750_s7 = sld [smem:[#allocation27_spill]] }
  0xf3   : > { %v638_v11 = vshrl.u32 %v4481_v9, 16  ;;  %v640_v12 = vshll.u32 %v4481_v9, 16  ;;  %v644_v13 = vshll.u32 %v4484_v10, 16  ;;  %v648_v14 = vshrl.u32 %v4484_v10, 16  ;;  %3358 = vmatprep.subr.bf16.mxu1 %v3732_v6  ;;  %3386 = vmatprep.subr.bf16.mxu0 %v3735_v24  ;;  %s4756_s24 = smov (!%p612_p8, %s4204_s24), 1 }
  0xf4   : > { %v790_v15 = vrot.slane %v4481_v9, 1  ;;  %v4492_v16 = vrot.slane %v4484_v10, 1  ;;  %v3081_v45 = vld [vmem:[%s4744_s27] ss:$0 sm:$0xff]  ;;  %s3614_s22 = smul.u32 24, %s4756_s24 }
  0xf5   : > { %v642_v17 = vrot.slane %v640_v12, 1  ;;  %v646_v18 = vrot.slane %v644_v13, 1 }
  0xf6   : > { %v4496_v19 = vsel %vm789_vm3, %v790_v15, %v4492_v16 }
  0xf7   : > { %v643_v20 = vor.u32 %v642_v17, %v638_v11  ;;  %v4498_v21 = vor.u32 %v648_v14, %v646_v18  ;;  %3370 = vmatprep.mubr.msk.bf16.mxu0 %vm663_vm2, %v4496_v19  ;;  %v3745_v11 = vld [vmem:[%s4706_s4 + $0x18] sm:$0xff]  }
  0xf8   : > { %3371 = vmatmul.mubr.msk.bf16.vlgmr.msra.gmra.mrb[0].mxu0 %vm663_vm2, %v4492_v16  ;;  %s616_s2 = scalar_lea.vmem %s4750_s7, %s3614_s22 }
  0xf9   : > { %v4505_v23 = vsel %vm637_vm0, %v643_v20, %v646_v18  ;;  %3387 = vmatpush3.bf16.msra.mxu0 %v3735_v24 }
  0xfa   : > { %3354 = vmatprep.mubr.msk.bf16.mxu1 %vm663_vm2, %v4505_v23  ;;  %3388 = vmatprep.subr.bf16.mxu0 %v3736_v25 }
  0xfb   : > { %3355 = vmatmul.mubr.msk.bf16.vlgmr.msra.gmra.mrb[0].mxu1 %vm663_vm2, %v4498_v21 }
  0xfc   : > { %3359 = vmatpush3.bf16.msra.mxu1 %v3732_v6  ;;  %3362 = vmatprep.mubr.msk.bf16.mxu1 %vm663_vm2, %v4481_v9 }
  0xfd   : > { %3360 = vmatprep.subr.bf16.mxu1 %v3734_v22  ;;  %3389 = vmatpush3.bf16.msra.mxu0 %v3736_v25 }
  0xfe   : > { %3390 = vmatprep.subr.bf16.mxu0 %v3738_v27 }
 0x100   : > { %3361 = vmatpush3.bf16.msra.mxu1 %v3734_v22  ;;  %v3747_v22 = vld [vmem:[%s4706_s4] sm:$0xff]  }
 0x101   : > { %3374 = vmatprep.subr.bf16.mxu1 %v3737_v26  ;;  %3391 = vmatpush3.bf16.msra.mxu0 %v3738_v27 }
 0x102   : > { %3392 = vmatprep.subr.bf16.mxu0 %v3740_v29 }
 0x103   : > { %3363 = vmatmul.mubr.msk.bf16.vlgmr.msra.gmra.mrb[4].mxu1 %vm663_vm2, %v4484_v10 }
 0x104   : > { %3375 = vmatpush3.bf16.msra.mxu1 %v3737_v26 }
 0x105   : > { %3376 = vmatprep.subr.bf16.mxu1 %v3739_v28  ;;  %3393 = vmatpush3.bf16.msra.mxu0 %v3740_v29  ;;  %v3748_v29 = vld [vmem:[#allocation6 + $0x50] sm:$0xff]  }
 0x106   : > { %3410 = vmatprep.subr.bf16.mxu0 %v3743_v31 }
 0x108   : > { %3377 = vmatpush3.bf16.msra.mxu1 %v3739_v28  ;;  %v3746_v28 = vld [vmem:[#allocation6 + $0x48] sm:$0xff]  }
 0x109   : > { %3378 = vmatprep.subr.bf16.mxu1 %v3741_v30 }
 0x10c   : > { %3379 = vmatpush3.bf16.msra.mxu1 %v3741_v30  ;;  %v3750_v30 = vld [vmem:[#allocation6 + $0x58] sm:$0xff]  }
 0x10d   : > { %3380 = vmatprep.subr.bf16.mxu1 %v3742_v32 }
 0x110   : > { %3381 = vmatpush3.bf16.msra.mxu1 %v3742_v32  ;;  %v3755_v32 = vld [vmem:[#allocation7 + $0x20] sm:$0xff]  }
 0x111   : > { %3398 = vmatprep.subr.bf16.mxu1 %v4518_v33 }
 0x1cb   : > { %v3372_v34 = vpop.f32.mrb[0].mxu0 }
 0x1cc   : > { %v845_v35 = vpop.f32.mrb[1].mxu0 }
 0x1cd   : > { %v3373_v36 = vpop.f32.mrb[2].mxu0 }
 0x1ce   : > { %v3356_v37 = vpop.f32.mrb[0].mxu1  ;;  %v848_v38 = vpop.f32.mrb[3].mxu0  ;;  %v4563_v36 = vld [vmem:[#allocation7 + $0x40] sm:$0xff]  }
 0x1cf   : > { %v704_v39 = vpop.f32.mrb[1].mxu1 }
 0x1d0   : > { %v3357_v40 = vpop.f32.mrb[2].mxu1 }
 0x1d1   : > { %v707_v41 = vpop.f32.mrb[3].mxu1 }
 0x1d6   : > { %v3364_v42 = vpop.f32.mrb[4].mxu1 }
 0x1d7   : > { %v777_v43 = vadd.f32 %v3364_v42, %v3356_v37  ;;  %v768_v44 = vpop.f32.mrb[5].mxu1 }
 0x1d8   : > { %v769_v46 = vadd.f32 %v768_v44, %v704_v39  ;;  %v3365_v47 = vpop.f32.mrb[6].mxu1 }
 0x1d9   : > { %v861_v48 = vadd.f32 %v3372_v34, %v777_v43  ;;  %v771_v49 = vpop.f32.mrb[7].mxu1  ;;  %v3757_v34 = vld [vmem:[#allocation7 + $0x28] sm:$0xff]  }
 0x1da   : > { %v859_v50 = vadd.f32 %v845_v35, %v769_v46  ;;  %v772_v51 = vadd.f32 %v771_v49, %v707_v41  ;;  %v3758_v35 = vld [vmem:[#allocation7 + $0x18] sm:$0xff]  }
 0x1db   : > { %v871_v52 = vadd.f32 %v3081_v45, %v861_v48 }
 0x1dc   : > { %v869_v53 = vadd.f32 %v3081_v45, %v859_v50  ;;  %v860_v54 = vadd.f32 %v848_v38, %v772_v51 }
 0x1dd   : > { %vm874_vm4 = vcmp.gt.f32.partialorder %v871_v52, 0.0  ;;  %v877_v55 = vmul.f32 0.2, %v871_v52 }
 0x1de   : > { %v875_v56 = vmul.f32 0.2, %v869_v53  ;;  %v870_v57 = vadd.f32 %v3081_v45, %v860_v54  ;;  %vm872_vm5 = vcmp.gt.f32.partialorder %v869_v53, 0.0 }
 0x1df   : > { %v880_v58 = vsel %vm874_vm4, %v871_v52, %v877_v55 }
 0x1e0   : > { %vm873_vm6 = vcmp.gt.f32.partialorder %v870_v57, 0.0  ;;  %v876_v59 = vmul.f32 0.2, %v870_v57  ;;  %v878_v60 = vsel %vm872_vm5, %v869_v53, %v875_v56  ;;  %v882_v62 = vpack.c.bf16 %v880_v58, %v880_v58 }
 0x1e2   : > { %v879_v61 = vsel %vm873_vm6, %v870_v57, %v876_v59  ;;  %v892_v1 = vshll.u32 %v882_v62, 16 }
 0x1e3   : > { %v881_v63 = vpack.c.bf16 %v879_v61, %v878_v60 }
 0x1e5   : > { %v885_v0 = vshrl.u32 %v881_v63, 16  ;;  %v888_v3 = vshll.u32 %v881_v63, 16 }
 0x1e7   : > { %v887_v2 = vrot.slane %v885_v0, 7 }
 0x1e9   : > { %v890_v4 = vor.u32 %v888_v3, %v887_v2  ;;  %v894_v5 = vsel %vm883_vm7, %v887_v2, %v892_v1 }
 0x1ea   : > { %v898_v6 = vsel %vm623_vm1, %v894_v5, 0  ;;  %v3120_v5 = vld [vmem:[%s4745_s16] ss:$0 sm:$0xff] }
 0x1eb   : > { %v896_v7 = vsel %vm623_vm1, 0, %v890_v4  ;;  %v922_v8 = vshll.u32 %v898_v6, 16  ;;  %v1096_v12 = vrot.slane %v898_v6, 1  ;;  %v926_v24 = vshrl.u32 %v898_v6, 16 }
 0x1ec   : > { %v918_v13 = vshll.u32 %v896_v7, 16  ;;  %3394 = vmatprep.mubr.msk.bf16.mxu0 %vm953_vm8, %v896_v7  ;;  %v1095_v14 = vrot.slane %v896_v7, 1  ;;  %v916_v15 = vshrl.u32 %v896_v7, 16 }
 0x1ed   : > { %3395 = vmatmul.mubr.msk.bf16.vlgmr.msra.gmra.mrb[4].mxu0 %vm953_vm8, %v898_v6  ;;  %v924_v18 = vrot.slane %v922_v8, 1 }
 0x1ee   : > { %v920_v17 = vrot.slane %v918_v13, 1  ;;  %3411 = vmatpush3.bf16.msra.mxu0 %v3743_v31  ;;  %v1097_v20 = vsel %vm789_vm3, %v1095_v14, %v1096_v12  ;;  %3414 = vmatprep.mubr.msk.bf16.mxu0 %vm663_vm2, %v4505_v23  ;;  %v3749_v23 = vld [vmem:[%s4706_s4 + $0x8] sm:$0xff]   ;;  %v3751_v31 = vld [vmem:[%s4706_s4 + $0x20] sm:$0xff]  }
 0x1ef   : > { %3412 = vmatprep.subr.bf16.mxu0 %v3745_v11  ;;  %v928_v27 = vor.u32 %v926_v24, %v924_v18 }
 0x1f0   : > { %v921_v25 = vor.u32 %v920_v17, %v916_v15 }
 0x1f2   : > { %v925_v26 = vsel %vm637_vm0, %v921_v25, %v924_v18  ;;  %3413 = vmatpush3.bf16.msra.mxu0 %v3745_v11 }
 0x1f3   : > { %3382 = vmatprep.mubr.msk.bf16.mxu1 %vm953_vm8, %v925_v26  ;;  %3418 = vmatprep.subr.bf16.mxu0 %v3747_v22 }
 0x1f4   : > { %3383 = vmatmul.mubr.msk.bf16.vlgmr.msra.gmra.mrb[8].mxu1 %vm953_vm8, %v928_v27 }
 0x1f5   : > { %3399 = vmatpush3.bf16.msra.mxu1 %v4518_v33  ;;  %3406 = vmatprep.mubr.msk.bf16.mxu1 %vm953_vm8, %v1097_v20  ;;  %v3756_v33 = vld [vmem:[#allocation7 + $0x10] sm:$0xff]  }
 0x1f6   : > { %3400 = vmatprep.subr.bf16.mxu1 %v3746_v28  ;;  %3415 = vmatmul.mubr.msk.bf16.vlgmr.msra.gmra.mrb[8].mxu0 %vm663_vm2, %v4498_v21  ;;  %v3754_v21 = vld [vmem:[#allocation7 + $0x8] sm:$0xff]  }
 0x1f7   : > { %3419 = vmatpush3.bf16.msra.mxu0 %v3747_v22  ;;  %3422 = vmatprep.mubr.msk.bf16.mxu0 %vm663_vm2, %v4481_v9  ;;  %v3752_v9 = vld [vmem:[%s4706_s4 + $0x28] sm:$0xff]  }
 0x1f8   : > { %3420 = vmatprep.subr.bf16.mxu0 %v3749_v23 }
 0x1f9   : > { %3401 = vmatpush3.bf16.msra.mxu1 %v3746_v28 }
 0x1fa   : > { %3402 = vmatprep.subr.bf16.mxu1 %v3748_v29 }
 0x1fb   : > { %3421 = vmatpush3.bf16.msra.mxu0 %v3749_v23 }
 0x1fc   : > { %3434 = vmatprep.subr.bf16.mxu0 %v3755_v32 }
 0x1fd   : > { %3403 = vmatpush3.bf16.msra.mxu1 %v3748_v29 }
 0x1fe   : > { %3404 = vmatprep.subr.bf16.mxu1 %v3750_v30  ;;  %3423 = vmatmul.mubr.msk.bf16.vlgmr.msra.gmra.mrb[12].mxu0 %vm663_vm2, %v4484_v10  ;;  %v3753_v10 = vld [vmem:[#allocation7] sm:$0xff]  }
 0x1ff   : > { %3435 = vmatpush3.bf16.msra.mxu0 %v3755_v32 }
 0x200   : > { %3436 = vmatprep.subr.bf16.mxu0 %v3757_v34 }
 0x201   : > { %3405 = vmatpush3.bf16.msra.mxu1 %v3750_v30 }
 0x202   : > { %3426 = vmatprep.subr.bf16.mxu1 %v3751_v31 }
 0x203   : > { %3437 = vmatpush3.bf16.msra.mxu0 %v3757_v34 }
 0x204   : > { %3407 = vmatmul.mubr.msk.bf16.vlgmr.msra.gmra.mrb[12].mxu1 %vm953_vm8, %v1096_v12 }
 0x205   : > { %3427 = vmatpush3.bf16.msra.mxu1 %v3751_v31  ;;  %3430 = vmatprep.mubr.msk.bf16.mxu1 %vm663_vm2, %v4496_v19  ;;  %v3759_v19 = vld [vmem:[#allocation7 + $0x30] sm:$0xff]  }
 0x206   : > { %3428 = vmatprep.subr.bf16.mxu1 %v3752_v9  ;;  %3438 = vmatprep.subr.bf16.mxu0 %v3759_v19 }
 0x207   : > { %3439 = vmatpush3.bf16.msra.mxu0 %v3759_v19 }
 0x209   : > { %3429 = vmatpush3.bf16.msra.mxu1 %v3752_v9 }
 0x20a   : > { %3446 = vmatprep.subr.bf16.mxu1 %v3753_v10 }
 0x20c   : > { %3431 = vmatmul.mubr.msk.bf16.vlgmr.msra.gmra.mrb[16].mxu1 %vm663_vm2, %v4492_v16  ;;  %v3760_v16 = vld [vmem:[#allocation7 + $0x38] sm:$0xff]  }
 0x20d   : > { %3447 = vmatpush3.bf16.msra.mxu1 %v3753_v10  ;;  %3440 = vmatprep.subr.bf16.mxu0 %v3760_v16 }
 0x20e   : > { %3448 = vmatprep.subr.bf16.mxu1 %v3754_v21  ;;  %3441 = vmatpush3.bf16.msra.mxu0 %v3760_v16 }
 0x20f   : > { %3458 = vmatprep.subr.bf16.mxu0 %v4563_v36 }
 0x211   : > { %3449 = vmatpush3.bf16.msra.mxu1 %v3754_v21 }
 0x212   : > { %3450 = vmatprep.subr.bf16.mxu1 %v3756_v33 }
 0x215   : > { %3451 = vmatpush3.bf16.msra.mxu1 %v3756_v33 }
 0x216   : > { %3452 = vmatprep.subr.bf16.mxu1 %v3758_v35 }
 0x219   : > { %3453 = vmatpush3.bf16.msra.mxu1 %v3758_v35 }
 0x2c0   : > { %v3396_v37 = vpop.f32.mrb[4].mxu0 }
 0x2c1   : > { %v1070_v38 = vpop.f32.mrb[5].mxu0 }
 0x2c2   : > { %v3397_v39 = vpop.f32.mrb[6].mxu0 }
 0x2c3   : > { %v1073_v40 = vpop.f32.mrb[7].mxu0 }
 0x2c7   : > { %v3384_v41 = vpop.f32.mrb[8].mxu1 }
 0x2c8   : > { %v1079_v42 = vadd.f32 %v3396_v37, %v3384_v41  ;;  %v994_v43 = vpop.f32.mrb[9].mxu1 }
 0x2c9   : > { %v1071_v44 = vadd.f32 %v1070_v38, %v994_v43  ;;  %v3385_v45 = vpop.f32.mrb[10].mxu1  ;;  %v3416_v46 = vpop.f32.mrb[8].mxu0 }
 0x2ca   : > { %v997_v47 = vpop.f32.mrb[11].mxu1  ;;  %v1234_v48 = vpop.f32.mrb[9].mxu0 }
 0x2cb   : > { %v1074_v49 = vadd.f32 %v1073_v40, %v997_v47  ;;  %v3417_v50 = vpop.f32.mrb[10].mxu0  ;;  %v3764_v47 = vld [vmem:[#allocation7 + $0x58] sm:$0xff]  }
 0x2cc   : > { %v1237_v51 = vpop.f32.mrb[11].mxu0  ;;  %v3767_v50 = vld [vmem:[#allocation9 + $0x20] sm:$0xff]  }
 0x2cd   : > { %3470 = vmatprep.subr.bf16.mxu1 %v3767_v50 }
 0x2d1   : > { %v3424_v52 = vpop.f32.mrb[12].mxu0 }
 0x2d2   : > { %v1303_v53 = vadd.f32 %v3424_v52, %v3416_v46  ;;  %v1294_v54 = vpop.f32.mrb[13].mxu0  ;;  %v3763_v46 = vld [vmem:[#allocation7 + $0x50] sm:$0xff]   ;;  %v3770_v52 = vld [vmem:[#allocation9 + $0x18] sm:$0xff]  }
 0x2d3   : > { %v1295_v55 = vadd.f32 %v1294_v54, %v1234_v48  ;;  %v3425_v56 = vpop.f32.mrb[14].mxu0  ;;  %v3765_v48 = vld [vmem:[#allocation9] sm:$0xff]   ;;  %v3772_v54 = vld [vmem:[#allocation9 + $0x38] sm:$0xff]  }
 0x2d4   : > { %v1297_v57 = vpop.f32.mrb[15].mxu0 }
 0x2d5   : > { %v1298_v58 = vadd.f32 %v1297_v57, %v1237_v51  ;;  %v3769_v51 = vld [vmem:[#allocation9 + $0x28] sm:$0xff]  }
 0x2d7   : > { %v3408_v59 = vpop.f32.mrb[12].mxu1 }
 0x2d8   : > { %v1178_v60 = vadd.f32 %v3408_v59, %v1079_v42  ;;  %v1162_v61 = vpop.f32.mrb[13].mxu1 }
 0x2d9   : > { %v1176_v62 = vadd.f32 %v1162_v61, %v1071_v44  ;;  %v3409_v63 = vpop.f32.mrb[14].mxu1  ;;  %v3762_v44 = vld [vmem:[#allocation7 + $0x48] sm:$0xff]  }
 0x2da   : > { %v1165_v0 = vpop.f32.mrb[15].mxu1 }
 0x2db   : > { %v1177_v1 = vadd.f32 %v1165_v0, %v1074_v49  ;;  %v3766_v49 = vld [vmem:[#allocation9 + $0x8] sm:$0xff]  }
 0x2df   : > { %v3432_v2 = vpop.f32.mrb[16].mxu1 }
 0x2e0   : > { %v1375_v3 = vadd.f32 %v3432_v2, %v1303_v53  ;;  %v1359_v4 = vpop.f32.mrb[17].mxu1  ;;  %v3771_v53 = vld [vmem:[#allocation9 + $0x30] sm:$0xff]  }
 0x2e1   : > { %v1373_v6 = vadd.f32 %v1359_v4, %v1295_v55  ;;  %v3433_v7 = vpop.f32.mrb[18].mxu1  ;;  %v3773_v55 = vld [vmem:[#allocation9 + $0x40] sm:$0xff]   ;;  %v3139_v4 = vld [vmem:[%s4746_s29] ss:$0 sm:$0xff] }
 0x2e2   : > { %v1378_v8 = vadd.f32 %v1375_v3, %v1178_v60  ;;  %v1362_v11 = vpop.f32.mrb[19].mxu1 }
 0x2e3   : > { %v1376_v12 = vadd.f32 %v1373_v6, %v1176_v62  ;;  %v1374_v13 = vadd.f32 %v1362_v11, %v1298_v58 }
 0x2e4   : > { %v1388_v14 = vadd.f32 %v3120_v5, %v1378_v8 }
 0x2e5   : > { %v1386_v15 = vadd.f32 %v3120_v5, %v1376_v12  ;;  %v1377_v17 = vadd.f32 %v1374_v13, %v1177_v1 }
 0x2e6   : > { %vm1391_vm9 = vcmp.gt.f32.partialorder %v1388_v14, 0.0  ;;  %v1394_v18 = vmul.f32 0.2, %v1388_v14 }
 0x2e7   : > { %v1392_v20 = vmul.f32 0.2, %v1386_v15  ;;  %v1387_v22 = vadd.f32 %v3120_v5, %v1377_v17  ;;  %vm1389_vm10 = vcmp.gt.f32.partialorder %v1386_v15, 0.0 }
 0x2e8   : > { %v4569_v24 = vsel %vm1391_vm9, %v1388_v14, %v1394_v18 }
 0x2e9   : > { %vm1390_vm11 = vcmp.gt.f32.partialorder %v1387_v22, 0.0  ;;  %v1393_v25 = vmul.f32 0.2, %v1387_v22  ;;  %v4571_v26 = vsel %vm1389_vm10, %v1386_v15, %v1392_v20  ;;  %v1399_v28 = vpack.c.bf16 %v4569_v24, %v4569_v24 }
 0x2eb   : > { %v4573_v27 = vsel %vm1390_vm11, %v1387_v22, %v1393_v25  ;;  %v1408_v30 = vshll.u32 %v1399_v28, 16 }
 0x2ec   : > { %v1398_v23 = vpack.c.bf16 %v4573_v27, %v4571_v26 }
 0x2ee   : > { %v1401_v29 = vshrl.u32 %v1398_v23, 16  ;;  %v1404_v9 = vshll.u32 %v1398_v23, 16 }
 0x2f0   : > { %v1403_v31 = vrot.slane %v1401_v29, 7 }
 0x2f2   : > { %v1406_v10 = vor.u32 %v1404_v9, %v1403_v31  ;;  %v1410_v21 = vsel %vm883_vm7, %v1403_v31, %v1408_v30 }
 0x2f3   : > { %v1414_v32 = vsel %vm623_vm1, %v1410_v21, 0 }
 0x2f4   : > { %v1412_v33 = vsel %vm623_vm1, 0, %v1406_v10  ;;  %v1438_v34 = vshll.u32 %v1414_v32, 16  ;;  %v1442_v39 = vshrl.u32 %v1414_v32, 16  ;;  %v1611_v41 = vrot.slane %v1414_v32, 1 }
 0x2f5   : > { %v1434_v35 = vshll.u32 %v1412_v33, 16  ;;  %3454 = vmatprep.mubr.msk.bf16.mxu1 %vm953_vm8, %v1412_v33  ;;  %v1432_v19 = vshrl.u32 %v1412_v33, 16  ;;  %v1610_v38 = vrot.slane %v1412_v33, 1 }
 0x2f6   : > { %3455 = vmatmul.mubr.msk.bf16.vlgmr.msra.gmra.mrb[20].mxu1 %vm953_vm8, %v1414_v32  ;;  %v1440_v37 = vrot.slane %v1438_v34, 1 }
 0x2f7   : > { %v1436_v16 = vrot.slane %v1434_v35, 1  ;;  %v1612_v45 = vsel %vm789_vm3, %v1610_v38, %v1611_v41  ;;  %3471 = vmatpush3.bf16.msra.mxu1 %v3767_v50  ;;  %v3778_v50 = vld [vmem:[#allocation10 + $0x8] sm:$0xff]  }
 0x2f8   : > { %v1444_v43 = vor.u32 %v1442_v39, %v1440_v37  ;;  %3472 = vmatprep.subr.bf16.mxu1 %v3769_v51 }
 0x2f9   : > { %v1437_v40 = vor.u32 %v1436_v16, %v1432_v19 }
 0x2fb   : > { %v1441_v42 = vsel %vm637_vm0, %v1437_v40, %v1440_v37  ;;  %3473 = vmatpush3.bf16.msra.mxu1 %v3769_v51  ;;  %v3780_v51 = vld [vmem:[#allocation10 + $0x10] sm:$0xff]  }
 0x2fc   : > { %3442 = vmatprep.mubr.msk.bf16.mxu0 %vm953_vm8, %v1441_v42  ;;  %3474 = vmatprep.subr.bf16.mxu1 %v3771_v53 }
 0x2fd   : > { %3443 = vmatmul.mubr.msk.bf16.vlgmr.msra.gmra.mrb[16].mxu0 %vm953_vm8, %v1444_v43 }
 0x2fe   : > { %3459 = vmatpush3.bf16.msra.mxu0 %v4563_v36  ;;  %3466 = vmatprep.mubr.msk.bf16.mxu0 %vm953_vm8, %v1612_v45  ;;  %v3768_v36 = vld [vmem:[#allocation9 + $0x10] sm:$0xff]  }
 0x2ff   : > { %3460 = vmatprep.subr.bf16.mxu0 %v3762_v44  ;;  %3475 = vmatpush3.bf16.msra.mxu1 %v3771_v53  ;;  %v3782_v53 = vld [vmem:[#allocation10 + $0x18] sm:$0xff]  }
 0x300   : > { %3476 = vmatprep.subr.bf16.mxu1 %v3772_v54 }
 0x302   : > { %3461 = vmatpush3.bf16.msra.mxu0 %v3762_v44 }
 0x303   : > { %3462 = vmatprep.subr.bf16.mxu0 %v3763_v46  ;;  %3477 = vmatpush3.bf16.msra.mxu1 %v3772_v54  ;;  %v3783_v54 = vld [vmem:[#allocation10 + $0x30] sm:$0xff]  }
 0x304   : > { %3494 = vmatprep.subr.bf16.mxu1 %v3773_v55 }
 0x306   : > { %3463 = vmatpush3.bf16.msra.mxu0 %v3763_v46  ;;  %v3774_v46 = vld [vmem:[#allocation9 + $0x48] sm:$0xff]  }
 0x307   : > { %3464 = vmatprep.subr.bf16.mxu0 %v3764_v47 }
 0x30a   : > { %3465 = vmatpush3.bf16.msra.mxu0 %v3764_v47  ;;  %v3775_v47 = vld [vmem:[#allocation9 + $0x50] sm:$0xff]  }
 0x30b   : > { %3482 = vmatprep.subr.bf16.mxu0 %v3765_v48 }
 0x30d   : > { %3467 = vmatmul.mubr.msk.bf16.vlgmr.msra.gmra.mrb[20].mxu0 %vm953_vm8, %v1611_v41 }
 0x30e   : > { %3483 = vmatpush3.bf16.msra.mxu0 %v3765_v48  ;;  %v3776_v48 = vld [vmem:[#allocation9 + $0x58] sm:$0xff]  }
 0x30f   : > { %3484 = vmatprep.subr.bf16.mxu0 %v3766_v49 }
 0x312   : > { %3485 = vmatpush3.bf16.msra.mxu0 %v3766_v49  ;;  %v3777_v49 = vld [vmem:[#allocation10] sm:$0xff]  }
 0x313   : > { %3486 = vmatprep.subr.bf16.mxu0 %v3768_v36 }
 0x316   : > { %3487 = vmatpush3.bf16.msra.mxu0 %v3768_v36  ;;  %v3779_v36 = vld [vmem:[#allocation10 + $0x20] sm:$0xff]  }
 0x317   : > { %3488 = vmatprep.subr.bf16.mxu0 %v3770_v52 }
 0x31a   : > { %3489 = vmatpush3.bf16.msra.mxu0 %v3770_v52  ;;  %v3781_v52 = vld [vmem:[#allocation10 + $0x28] sm:$0xff]  }
 0x31b   : > { %3506 = vmatprep.subr.bf16.mxu0 %v3779_v36 }
 0x3c9   : > { %v3456_v56 = vpop.f32.mrb[20].mxu1 }
 0x3ca   : > { %v1585_v57 = vpop.f32.mrb[21].mxu1 }
 0x3cb   : > { %v3457_v58 = vpop.f32.mrb[22].mxu1 }
 0x3cc   : > { %v1588_v59 = vpop.f32.mrb[23].mxu1 }
 0x3d0   : > { %v3444_v60 = vpop.f32.mrb[16].mxu0 }
 0x3d1   : > { %v1594_v61 = vadd.f32 %v3456_v56, %v3444_v60  ;;  %v1509_v62 = vpop.f32.mrb[17].mxu0  ;;  %v4605_v56 = vld [vmem:[#allocation10 + $0x40] sm:$0xff]  }
 0x3d2   : > { %v1586_v63 = vadd.f32 %v1585_v57, %v1509_v62  ;;  %v3445_v0 = vpop.f32.mrb[18].mxu0 }
 0x3d3   : > { %v1512_v1 = vpop.f32.mrb[19].mxu0 }
 0x3d4   : > { %v1589_v2 = vadd.f32 %v1588_v59, %v1512_v1 }
 0x3e0   : > { %v3468_v3 = vpop.f32.mrb[20].mxu0 }
 0x3e1   : > { %v1693_v5 = vadd.f32 %v3468_v3, %v1594_v61  ;;  %v1677_v6 = vpop.f32.mrb[21].mxu0 }
 0x3e2   : > { %v1691_v7 = vadd.f32 %v1677_v6, %v1586_v63  ;;  %v3469_v8 = vpop.f32.mrb[22].mxu0 }
 0x3e3   : > { %v1703_v11 = vadd.f32 %v3139_v4, %v1693_v5  ;;  %v1680_v12 = vpop.f32.mrb[23].mxu0  ;;  %v3158_v5 = vld [vmem:[%s4747_s21] ss:$0 sm:$0xff] }
 0x3e4   : > { %v1701_v13 = vadd.f32 %v3139_v4, %v1691_v7  ;;  %v1692_v14 = vadd.f32 %v1680_v12, %v1589_v2 }
 0x3e5   : > { %vm1706_vm12 = vcmp.gt.f32.partialorder %v1703_v11, 0.0  ;;  %v1709_v15 = vmul.f32 0.2, %v1703_v11 }
 0x3e6   : > { %v1707_v17 = vmul.f32 0.2, %v1701_v13  ;;  %v1702_v18 = vadd.f32 %v3139_v4, %v1692_v14  ;;  %vm1704_vm13 = vcmp.gt.f32.partialorder %v1701_v13, 0.0 }
 0x3e7   : > { %v1712_v20 = vsel %vm1706_vm12, %v1703_v11, %v1709_v15 }
 0x3e8   : > { %vm1705_vm14 = vcmp.gt.f32.partialorder %v1702_v18, 0.0  ;;  %v1708_v22 = vmul.f32 0.2, %v1702_v18  ;;  %v1710_v25 = vsel %vm1704_vm13, %v1701_v13, %v1707_v17  ;;  %v1714_v23 = vpack.c.bf16 %v1712_v20, %v1712_v20 }
 0x3ea   : > { %v1711_v28 = vsel %vm1705_vm14, %v1702_v18, %v1708_v22  ;;  %v1723_v31 = vshll.u32 %v1714_v23, 16 }
 0x3eb   : > { %v1713_v29 = vpack.c.bf16 %v1711_v28, %v1710_v25 }
 0x3ed   : > { %v1716_v30 = vshrl.u32 %v1713_v29, 16  ;;  %v1719_v10 = vshll.u32 %v1713_v29, 16 }
 0x3ef   : > { %v1718_v9 = vrot.slane %v1716_v30, 7 }
 0x3f1   : > { %v1721_v21 = vor.u32 %v1719_v10, %v1718_v9  ;;  %v1725_v32 = vsel %vm883_vm7, %v1718_v9, %v1723_v31 }
 0x3f2   : > { %v1729_v33 = vsel %vm623_vm1, %v1725_v32, 0 }
 0x3f3   : > { %v1727_v34 = vsel %vm623_vm1, 0, %v1721_v21  ;;  %v1753_v35 = vshll.u32 %v1729_v33, 16  ;;  %v1926_v19 = vrot.slane %v1729_v33, 1  ;;  %v1757_v42 = vshrl.u32 %v1729_v33, 16 }
 0x3f4   : > { %v1749_v16 = vshll.u32 %v1727_v34, 16  ;;  %3490 = vmatprep.mubr.msk.bf16.mxu0 %vm953_vm8, %v1727_v34  ;;  %v1925_v37 = vrot.slane %v1727_v34, 1  ;;  %v1747_v38 = vshrl.u32 %v1727_v34, 16 }
 0x3f5   : > { %3491 = vmatmul.mubr.msk.bf16.vlgmr.msra.gmra.mrb[24].mxu0 %vm953_vm8, %v1729_v33  ;;  %v1755_v40 = vrot.slane %v1753_v35, 1 }
 0x3f6   : > { %v1751_v39 = vrot.slane %v1749_v16, 1  ;;  %v1927_v41 = vsel %vm789_vm3, %v1925_v37, %v1926_v19  ;;  %3507 = vmatpush3.bf16.msra.mxu0 %v3779_v36  ;;  %v3790_v36 = vld [vmem:[#allocation12 + $0x8] sm:$0xff]  }
 0x3f7   : > { %v1759_v45 = vor.u32 %v1757_v42, %v1755_v40  ;;  %3508 = vmatprep.subr.bf16.mxu0 %v3781_v52 }
 0x3f8   : > { %v1752_v43 = vor.u32 %v1751_v39, %v1747_v38 }
 0x3fa   : > { %v1756_v44 = vsel %vm637_vm0, %v1752_v43, %v1755_v40  ;;  %3509 = vmatpush3.bf16.msra.mxu0 %v3781_v52  ;;  %v3792_v52 = vld [vmem:[#allocation12 + $0x10] sm:$0xff]  }
 0x3fb   : > { %3478 = vmatprep.mubr.msk.bf16.mxu1 %vm953_vm8, %v1756_v44  ;;  %3510 = vmatprep.subr.bf16.mxu0 %v3783_v54 }
 0x3fc   : > { %3479 = vmatmul.mubr.msk.bf16.vlgmr.msra.gmra.mrb[24].mxu1 %vm953_vm8, %v1759_v45 }
 0x3fd   : > { %3495 = vmatpush3.bf16.msra.mxu1 %v3773_v55  ;;  %3502 = vmatprep.mubr.msk.bf16.mxu1 %vm953_vm8, %v1927_v41  ;;  %v3784_v55 = vld [vmem:[#allocation10 + $0x38] sm:$0xff]  }
 0x3fe   : > { %3496 = vmatprep.subr.bf16.mxu1 %v3774_v46  ;;  %3511 = vmatpush3.bf16.msra.mxu0 %v3783_v54  ;;  %v3794_v54 = vld [vmem:[#allocation12 + $0x18] sm:$0xff]  }
 0x3ff   : > { %3512 = vmatprep.subr.bf16.mxu0 %v3784_v55 }
 0x401   : > { %3497 = vmatpush3.bf16.msra.mxu1 %v3774_v46  ;;  %v3786_v46 = vld [vmem:[#allocation10 + $0x48] sm:$0xff]  }
 0x402   : > { %3498 = vmatprep.subr.bf16.mxu1 %v3775_v47  ;;  %3513 = vmatpush3.bf16.msra.mxu0 %v3784_v55  ;;  %v3795_v55 = vld [vmem:[#allocation12 + $0x30] sm:$0xff]  }
 0x403   : > { %3530 = vmatprep.subr.bf16.mxu0 %v4605_v56 }
 0x405   : > { %3499 = vmatpush3.bf16.msra.mxu1 %v3775_v47 }
 0x406   : > { %3500 = vmatprep.subr.bf16.mxu1 %v3776_v48 }
 0x409   : > { %3501 = vmatpush3.bf16.msra.mxu1 %v3776_v48  ;;  %v3787_v48 = vld [vmem:[#allocation10 + $0x50] sm:$0xff]  }
 0x40a   : > { %3518 = vmatprep.subr.bf16.mxu1 %v3777_v49 }
 0x40c   : > { %3503 = vmatmul.mubr.msk.bf16.vlgmr.msra.gmra.mrb[28].mxu1 %vm953_vm8, %v1926_v19 }
 0x40d   : > { %3519 = vmatpush3.bf16.msra.mxu1 %v3777_v49  ;;  %v3788_v49 = vld [vmem:[#allocation10 + $0x58] sm:$0xff]  }
 0x40e   : > { %3520 = vmatprep.subr.bf16.mxu1 %v3778_v50 }
 0x411   : > { %3521 = vmatpush3.bf16.msra.mxu1 %v3778_v50  ;;  %v3789_v50 = vld [vmem:[#allocation12] sm:$0xff]  }
 0x412   : > { %3522 = vmatprep.subr.bf16.mxu1 %v3780_v51 }
 0x415   : > { %3523 = vmatpush3.bf16.msra.mxu1 %v3780_v51  ;;  %v3791_v51 = vld [vmem:[#allocation12 + $0x20] sm:$0xff]  }
 0x416   : > { %3524 = vmatprep.subr.bf16.mxu1 %v3782_v53 }
 0x419   : > { %3525 = vmatpush3.bf16.msra.mxu1 %v3782_v53  ;;  %v3793_v53 = vld [vmem:[#allocation12 + $0x28] sm:$0xff]  }
 0x41a   : > { %3542 = vmatprep.subr.bf16.mxu1 %v3791_v51 }
 0x4c8   : > { %v3492_v57 = vpop.f32.mrb[24].mxu0 }
 0x4c9   : > { %v1900_v58 = vpop.f32.mrb[25].mxu0 }
 0x4ca   : > { %v3493_v59 = vpop.f32.mrb[26].mxu0 }
 0x4cb   : > { %v1903_v60 = vpop.f32.mrb[27].mxu0 }
 0x4cf   : > { %v3480_v61 = vpop.f32.mrb[24].mxu1 }
 0x4d0   : > { %v1909_v62 = vadd.f32 %v3492_v57, %v3480_v61  ;;  %v1824_v63 = vpop.f32.mrb[25].mxu1  ;;  %v3797_v57 = vld [vmem:[#allocation12 + $0x38] sm:$0xff]  }
 0x4d1   : > { %v1901_v0 = vadd.f32 %v1900_v58, %v1824_v63  ;;  %v3481_v1 = vpop.f32.mrb[26].mxu1  ;;  %v4651_v58 = vld [vmem:[#allocation12 + $0x40] sm:$0xff]  }
 0x4d2   : > { %v1827_v2 = vpop.f32.mrb[27].mxu1 }
 0x4d3   : > { %v1904_v3 = vadd.f32 %v1903_v60, %v1827_v2 }
 0x4df   : > { %v3504_v4 = vpop.f32.mrb[28].mxu1 }
 0x4e0   : > { %v2008_v6 = vadd.f32 %v3504_v4, %v1909_v62  ;;  %v1992_v7 = vpop.f32.mrb[29].mxu1 }
 0x4e1   : > { %v2006_v8 = vadd.f32 %v1992_v7, %v1901_v0  ;;  %v3505_v11 = vpop.f32.mrb[30].mxu1  ;;  %v3177_v7 = vld [vmem:[%s4748_s17] ss:$0 sm:$0xff] }
 0x4e2   : > { %v2018_v12 = vadd.f32 %v3158_v5, %v2008_v6  ;;  %v1995_v13 = vpop.f32.mrb[31].mxu1 }
 0x4e3   : > { %v2016_v14 = vadd.f32 %v3158_v5, %v2006_v8  ;;  %v2007_v15 = vadd.f32 %v1995_v13, %v1904_v3 }
 0x4e4   : > { %v2021_v17 = vadd.f32 %v2018_v12, %v4569_v24 }
 0x4e5   : > { %v2019_v18 = vadd.f32 %v2016_v14, %v4571_v26  ;;  %v2017_v20 = vadd.f32 %v3158_v5, %v2007_v15 }
 0x4e6   : > { %vm2024_vm15 = vcmp.gt.f32.partialorder %v2021_v17, 0.0  ;;  %v2027_v22 = vmul.f32 0.2, %v2021_v17 }
 0x4e7   : > { %v2025_v25 = vmul.f32 0.2, %v2019_v18  ;;  %v2020_v28 = vadd.f32 %v2017_v20, %v4573_v27  ;;  %vm2022_vm2 = vcmp.gt.f32.partialorder %v2019_v18, 0.0 }
 0x4e8   : > { %v2030_v23 = vsel %vm2024_vm15, %v2021_v17, %v2027_v22 }
 0x4e9   : > { %vm2023_vm4 = vcmp.gt.f32.partialorder %v2020_v28, 0.0  ;;  %v2026_v29 = vmul.f32 0.2, %v2020_v28  ;;  %v2028_v30 = vsel %vm2022_vm2, %v2019_v18, %v2025_v25  ;;  %v2032_v9 = vpack.c.bf16 %v2030_v23, %v2030_v23 }
 0x4eb   : > { %v2029_v31 = vsel %vm2023_vm4, %v2020_v28, %v2026_v29  ;;  %v2041_v32 = vshll.u32 %v2032_v9, 16 }
 0x4ec   : > { %v2031_v10 = vpack.c.bf16 %v2029_v31, %v2028_v30 }
 0x4ee   : > { %v2034_v21 = vshrl.u32 %v2031_v10, 16  ;;  %v2037_v24 = vshll.u32 %v2031_v10, 16 }
 0x4f0   : > { %v2036_v33 = vrot.slane %v2034_v21, 7 }
 0x4f2   : > { %v2039_v34 = vor.u32 %v2037_v24, %v2036_v33  ;;  %v2043_v26 = vsel %vm883_vm7, %v2036_v33, %v2041_v32 }
 0x4f3   : > { %v4616_v35 = vsel %vm623_vm1, %v2043_v26, 0 }
 0x4f4   : > { %v4619_v27 = vsel %vm623_vm1, 0, %v2039_v34  ;;  %v2071_v19 = vshll.u32 %v4616_v35, 16  ;;  %v2075_v41 = vshrl.u32 %v4616_v35, 16  ;;  %v4631_v43 = vrot.slane %v4616_v35, 1 }
 0x4f5   : > { %3526 = vmatprep.mubr.msk.bf16.mxu1 %vm953_vm8, %v4619_v27  ;;  %v2067_v16 = vshll.u32 %v4619_v27, 16  ;;  %v2065_v37 = vshrl.u32 %v4619_v27, 16  ;;  %v2243_v42 = vrot.slane %v4619_v27, 1 }
 0x4f6   : > { %3527 = vmatmul.mubr.msk.bf16.vlgmr.msra.gmra.mrb[32].mxu1 %vm953_vm8, %v4616_v35  ;;  %v2073_v39 = vrot.slane %v2071_v19, 1 }
 0x4f7   : > { %v2069_v38 = vrot.slane %v2067_v16, 1  ;;  %v4644_v47 = vsel %vm789_vm3, %v2243_v42, %v4631_v43  ;;  %3543 = vmatpush3.bf16.msra.mxu1 %v3791_v51  ;;  %v3798_v16 = vld [vmem:[#allocation13 + $0x28] sm:$0xff]  }
 0x4f8   : > { %v4636_v45 = vor.u32 %v2075_v41, %v2073_v39  ;;  %3544 = vmatprep.subr.bf16.mxu1 %v3793_v53 }
 0x4f9   : > { %v2070_v40 = vor.u32 %v2069_v38, %v2065_v37 }
 0x4fb   : > { %v4634_v44 = vsel %vm637_vm0, %v2070_v40, %v2073_v39  ;;  %3545 = vmatpush3.bf16.msra.mxu1 %v3793_v53  ;;  %v3801_v53 = vld [vmem:[#allocation12 + $0x48] sm:$0xff]  }
 0x4fc   : > { %3514 = vmatprep.mubr.msk.bf16.mxu0 %vm953_vm8, %v4634_v44  ;;  %3546 = vmatprep.subr.bf16.mxu1 %v3795_v55 }
 0x4fd   : > { %3515 = vmatmul.mubr.msk.bf16.vlgmr.msra.gmra.mrb[28].mxu0 %vm953_vm8, %v4636_v45 }
 0x4fe   : > { %3531 = vmatpush3.bf16.msra.mxu0 %v4605_v56  ;;  %3538 = vmatprep.mubr.msk.bf16.mxu0 %vm953_vm8, %v4644_v47  ;;  %v3796_v56 = vld [vmem:[#allocation13 + $0x20] sm:$0xff]  }
 0x4ff   : > { %3532 = vmatprep.subr.bf16.mxu0 %v3786_v46  ;;  %3547 = vmatpush3.bf16.msra.mxu1 %v3795_v55  ;;  %v3804_v55 = vld [vmem:[#allocation13 + $0x40] sm:$0xff]  }
 0x500   : > { %3548 = vmatprep.subr.bf16.mxu1 %v3797_v57 }
 0x502   : > { %3533 = vmatpush3.bf16.msra.mxu0 %v3786_v46 }
 0x503   : > { %3534 = vmatprep.subr.bf16.mxu0 %v3787_v48  ;;  %3549 = vmatpush3.bf16.msra.mxu1 %v3797_v57  ;;  %v3806_v57 = vld [vmem:[#allocation13 + $0x48] sm:$0xff]  }
 0x504   : > { %3566 = vmatprep.subr.bf16.mxu1 %v4651_v58 }
 0x506   : > { %3535 = vmatpush3.bf16.msra.mxu0 %v3787_v48 }
 0x507   : > { %3536 = vmatprep.subr.bf16.mxu0 %v3788_v49 }
 0x50a   : > { %3537 = vmatpush3.bf16.msra.mxu0 %v3788_v49  ;;  %v3800_v49 = vld [vmem:[#allocation13 + $0x30] sm:$0xff]  }
 0x50b   : > { %3554 = vmatprep.subr.bf16.mxu0 %v3789_v50 }
 0x50d   : > { %3539 = vmatmul.mubr.msk.bf16.vlgmr.msra.gmra.mrb[32].mxu0 %vm953_vm8, %v4631_v43 }
 0x50e   : > { %3555 = vmatpush3.bf16.msra.mxu0 %v3789_v50 }
 0x50f   : > { %3556 = vmatprep.subr.bf16.mxu0 %v3790_v36 }
 0x512   : > { %3557 = vmatpush3.bf16.msra.mxu0 %v3790_v36 }
 0x513   : > { %3558 = vmatprep.subr.bf16.mxu0 %v3792_v52 }
 0x516   : > { %3559 = vmatpush3.bf16.msra.mxu0 %v3792_v52 }
 0x517   : > { %3560 = vmatprep.subr.bf16.mxu0 %v3794_v54 }
 0x51a   : > { %3561 = vmatpush3.bf16.msra.mxu0 %v3794_v54  ;;  %v3802_v54 = vld [vmem:[#allocation13 + $0x38] sm:$0xff]  }
 0x51b   : > { %3578 = vmatprep.subr.bf16.mxu0 %v3796_v56 }
 0x5c9   : > { %v3528_v59 = vpop.f32.mrb[32].mxu1 }
 0x5ca   : > { %v2218_v60 = vpop.f32.mrb[33].mxu1 }
 0x5cb   : > { %v3529_v61 = vpop.f32.mrb[34].mxu1 }
 0x5cc   : > { %v2221_v62 = vpop.f32.mrb[35].mxu1  ;;  %v3810_v61 = vld [vmem:[#allocation13 + $0x58] sm:$0xff]  }
 0x5d0   : > { %v3516_v63 = vpop.f32.mrb[28].mxu0 }
 0x5d1   : > { %v2227_v0 = vadd.f32 %v3528_v59, %v3516_v63  ;;  %v2142_v1 = vpop.f32.mrb[29].mxu0  ;;  %v3808_v59 = vld [vmem:[#allocation13 + $0x50] sm:$0xff]  }
 0x5d2   : > { %v2219_v2 = vadd.f32 %v2218_v60, %v2142_v1  ;;  %v3517_v3 = vpop.f32.mrb[30].mxu0  ;;  %v3809_v60 = vld [vmem:[#allocation13 + $0x8] sm:$0xff]  }
 0x5d3   : > { %v2145_v4 = vpop.f32.mrb[31].mxu0 }
 0x5d4   : > { %v2222_v5 = vadd.f32 %v2221_v62, %v2145_v4 }
 0x5e0   : > { %v3540_v6 = vpop.f32.mrb[32].mxu0 }
 0x5e1   : > { %v2326_v8 = vadd.f32 %v3540_v6, %v2227_v0  ;;  %v2310_v11 = vpop.f32.mrb[33].mxu0 }
 0x5e2   : > { %v2324_v12 = vadd.f32 %v2310_v11, %v2219_v2  ;;  %v3541_v13 = vpop.f32.mrb[34].mxu0 }
 0x5e3   : > { %v2336_v14 = vadd.f32 %v3177_v7, %v2326_v8  ;;  %v2313_v15 = vpop.f32.mrb[35].mxu0 }
 0x5e4   : > { %v2334_v17 = vadd.f32 %v3177_v7, %v2324_v12  ;;  %v2325_v18 = vadd.f32 %v2313_v15, %v2222_v5 }
 0x5e5   : > { %vm2339_vm5 = vcmp.gt.f32.partialorder %v2336_v14, 0.0  ;;  %v2342_v20 = vmul.f32 0.2, %v2336_v14 }
 0x5e6   : > { %v2340_v22 = vmul.f32 0.2, %v2334_v17  ;;  %v2335_v25 = vadd.f32 %v3177_v7, %v2325_v18  ;;  %vm2337_vm6 = vcmp.gt.f32.partialorder %v2334_v17, 0.0 }
 0x5e7   : > { %v2345_v28 = vsel %vm2339_vm5, %v2336_v14, %v2342_v20 }
 0x5e8   : > { %vm2338_vm9 = vcmp.gt.f32.partialorder %v2335_v25, 0.0  ;;  %v2341_v23 = vmul.f32 0.2, %v2335_v25  ;;  %v2343_v29 = vsel %vm2337_vm6, %v2334_v17, %v2340_v22  ;;  %v2347_v31 = vpack.c.bf16 %v2345_v28, %v2345_v28 }
 0x5ea   : > { %v2344_v30 = vsel %vm2338_vm9, %v2335_v25, %v2341_v23  ;;  %v2356_v21 = vshll.u32 %v2347_v31, 16 }
 0x5eb   : > { %v2346_v9 = vpack.c.bf16 %v2344_v30, %v2343_v29 }
 0x5ed   : > { %v2349_v10 = vshrl.u32 %v2346_v9, 16  ;;  %v2352_v33 = vshll.u32 %v2346_v9, 16 }
 0x5ef   : > { %v2351_v32 = vrot.slane %v2349_v10, 7 }
 0x5f1   : > { %v2354_v24 = vor.u32 %v2352_v33, %v2351_v32  ;;  %v2358_v34 = vsel %vm883_vm7, %v2351_v32, %v2356_v21  ;;  %v3214_v33 = vld [vmem:[%s4749_s9] ss:$0 sm:$0xff] }
 0x5f2   : > { %v2362_v26 = vsel %vm623_vm1, %v2358_v34, 0 }
 0x5f3   : > { %v2360_v19 = vsel %vm623_vm1, 0, %v2354_v24  ;;  %v2386_v37 = vshll.u32 %v2362_v26, 16  ;;  %v2559_v38 = vrot.slane %v2362_v26, 1  ;;  %v2390_v50 = vshrl.u32 %v2362_v26, 16 }
 0x5f4   : > { %v2382_v39 = vshll.u32 %v2360_v19, 16  ;;  %3562 = vmatprep.mubr.msk.bf16.mxu0 %vm953_vm8, %v2360_v19  ;;  %v2558_v40 = vrot.slane %v2360_v19, 1  ;;  %v2380_v41 = vshrl.u32 %v2360_v19, 16 }
 0x5f5   : > { %3563 = vmatmul.mubr.msk.bf16.vlgmr.msra.gmra.mrb[36].mxu0 %vm953_vm8, %v2362_v26  ;;  %v2388_v46 = vrot.slane %v2386_v37, 1 }
 0x5f6   : > { %v2384_v42 = vrot.slane %v2382_v39, 1  ;;  %3579 = vmatpush3.bf16.msra.mxu0 %v3796_v56  ;;  %3586 = vmatprep.mubr.msk.bf16.mxu0 %vm953_vm8, %v4634_v44  ;;  %v2560_v48 = vsel %vm789_vm3, %v2558_v40, %v2559_v38  ;;  %v3803_v44 = vld [vmem:[#allocation12 + $0x50] sm:$0xff]   ;;  %v3805_v56 = vld [vmem:[#allocation12 + $0x58] sm:$0xff]  }
 0x5f7   : > { %3580 = vmatprep.subr.bf16.mxu0 %v3798_v16  ;;  %v2392_v52 = vor.u32 %v2390_v50, %v2388_v46 }
 0x5f8   : > { %v2385_v36 = vor.u32 %v2384_v42, %v2380_v41 }
 0x5fa   : > { %3581 = vmatpush3.bf16.msra.mxu0 %v3798_v16  ;;  %v2389_v51 = vsel %vm637_vm0, %v2385_v36, %v2388_v46 }
 0x5fb   : > { %3550 = vmatprep.mubr.msk.bf16.mxu1 %vm953_vm8, %v2389_v51  ;;  %3582 = vmatprep.subr.bf16.mxu0 %v3800_v49 }
 0x5fc   : > { %3551 = vmatmul.mubr.msk.bf16.vlgmr.msra.gmra.mrb[36].mxu1 %vm953_vm8, %v2392_v52 }
 0x5fd   : > { %3567 = vmatpush3.bf16.msra.mxu1 %v4651_v58  ;;  %3574 = vmatprep.mubr.msk.bf16.mxu1 %vm953_vm8, %v2560_v48  ;;  %v3807_v58 = vld [vmem:[#allocation13] sm:$0xff]  }
 0x5fe   : > { %3583 = vmatpush3.bf16.msra.mxu0 %v3800_v49  ;;  %3568 = vmatprep.subr.bf16.mxu1 %v3801_v53 }
 0x5ff   : > { %3584 = vmatprep.subr.bf16.mxu0 %v3802_v54 }
 0x601   : > { %3569 = vmatpush3.bf16.msra.mxu1 %v3801_v53 }
 0x602   : > { %3585 = vmatpush3.bf16.msra.mxu0 %v3802_v54  ;;  %3570 = vmatprep.subr.bf16.mxu1 %v3803_v44 }
 0x603   : > { %3602 = vmatprep.subr.bf16.mxu0 %v3804_v55 }
 0x605   : > { %3571 = vmatpush3.bf16.msra.mxu1 %v3803_v44  ;;  %3587 = vmatmul.mubr.msk.bf16.vlgmr.msra.gmra.mrb[40].mxu0 %vm953_vm8, %v4636_v45  ;;  %v3811_v45 = vld [vmem:[#allocation13 + $0x10] sm:$0xff]  }
 0x606   : > { %3603 = vmatpush3.bf16.msra.mxu0 %v3804_v55  ;;  %3610 = vmatprep.mubr.msk.bf16.mxu0 %vm953_vm8, %v4644_v47  ;;  %v3812_v47 = vld [vmem:[#allocation13 + $0x18] sm:$0xff]  }
 0x607   : > { %3572 = vmatprep.subr.bf16.mxu1 %v3805_v56  ;;  %3604 = vmatprep.subr.bf16.mxu0 %v3806_v57 }
 0x609   : > { %3573 = vmatpush3.bf16.msra.mxu1 %v3805_v56 }
 0x60a   : > { %3605 = vmatpush3.bf16.msra.mxu0 %v3806_v57  ;;  %3590 = vmatprep.subr.bf16.mxu1 %v3807_v58 }
 0x60b   : > { %3606 = vmatprep.subr.bf16.mxu0 %v3808_v59 }
 0x60c   : > { %3575 = vmatmul.mubr.msk.bf16.vlgmr.msra.gmra.mrb[40].mxu1 %vm953_vm8, %v2559_v38 }
 0x60d   : > { %3591 = vmatpush3.bf16.msra.mxu1 %v3807_v58  ;;  %3598 = vmatprep.mubr.msk.bf16.mxu1 %vm953_vm8, %v4619_v27 }
 0x60e   : > { %3607 = vmatpush3.bf16.msra.mxu0 %v3808_v59  ;;  %3592 = vmatprep.subr.bf16.mxu1 %v3809_v60 }
 0x60f   : > { %3608 = vmatprep.subr.bf16.mxu0 %v3810_v61 }
 0x611   : > { %3593 = vmatpush3.bf16.msra.mxu1 %v3809_v60 }
 0x612   : > { %3609 = vmatpush3.bf16.msra.mxu0 %v3810_v61  ;;  %3594 = vmatprep.subr.bf16.mxu1 %v3811_v45 }
 0x615   : > { %3595 = vmatpush3.bf16.msra.mxu1 %v3811_v45  ;;  %3611 = vmatmul.mubr.msk.bf16.vlgmr.msra.gmra.mrb[44].mxu0 %vm953_vm8, %v4631_v43 }
 0x616   : > { %3596 = vmatprep.subr.bf16.mxu1 %v3812_v47 }
 0x619   : > { %3597 = vmatpush3.bf16.msra.mxu1 %v3812_v47 }
 0x61c   : > { %3599 = vmatmul.mubr.msk.bf16.vlgmr.msra.gmra.mrb[44].mxu1 %vm953_vm8, %v4616_v35 }
 0x6c8   : > { %v3564_v62 = vpop.f32.mrb[36].mxu0 }
 0x6c9   : > { %v2533_v63 = vpop.f32.mrb[37].mxu0 }
 0x6ca   : > { %v3565_v27 = vpop.f32.mrb[38].mxu0 }
 0x6cb   : > { %v2536_v0 = vpop.f32.mrb[39].mxu0 }
 0x6cf   : > { %v3552_v1 = vpop.f32.mrb[36].mxu1 }
 0x6d0   : > { %v2542_v2 = vadd.f32 %v3564_v62, %v3552_v1  ;;  %v2457_v3 = vpop.f32.mrb[37].mxu1 }
 0x6d1   : > { %v2534_v4 = vadd.f32 %v2533_v63, %v2457_v3  ;;  %v3553_v5 = vpop.f32.mrb[38].mxu1 }
 0x6d2   : > { %v2460_v6 = vpop.f32.mrb[39].mxu1 }
 0x6d3   : > { %v2537_v7 = vadd.f32 %v2536_v0, %v2460_v6 }
 0x6d8   : > { %v3588_v8 = vpop.f32.mrb[40].mxu0 }
 0x6d9   : > { %v2717_v11 = vpop.f32.mrb[41].mxu0 }
 0x6da   : > { %v3589_v43 = vpop.f32.mrb[42].mxu0 }
 0x6db   : > { %v2720_v12 = vpop.f32.mrb[43].mxu0 }
 0x6df   : > { %v3576_v13 = vpop.f32.mrb[40].mxu1 }
 0x6e0   : > { %v2641_v14 = vadd.f32 %v3576_v13, %v2542_v2  ;;  %v2625_v35 = vpop.f32.mrb[41].mxu1 }
 0x6e1   : > { %v2639_v15 = vadd.f32 %v2625_v35, %v2534_v4  ;;  %v3577_v17 = vpop.f32.mrb[42].mxu1 }
 0x6e2   : > { %v2628_v18 = vpop.f32.mrb[43].mxu1 }
 0x6e3   : > { %v2640_v20 = vadd.f32 %v2628_v18, %v2537_v7 }
 0x6e8   : > { %v3612_v22 = vpop.f32.mrb[44].mxu0 }
 0x6e9   : > { %v2870_v25 = vpop.f32.mrb[45].mxu0 }
 0x6ea   : > { %v3613_v28 = vpop.f32.mrb[46].mxu0 }
 0x6eb   : > { %v2873_v23 = vpop.f32.mrb[47].mxu0 }
 0x6ef   : > { %v3600_v29 = vpop.f32.mrb[44].mxu1 }
 0x6f0   : > { %v2798_v30 = vadd.f32 %v3600_v29, %v3588_v8  ;;  %v2789_v31 = vpop.f32.mrb[45].mxu1 }
 0x6f1   : > { %v2790_v9 = vadd.f32 %v2789_v31, %v2717_v11  ;;  %v3601_v10 = vpop.f32.mrb[46].mxu1 }
 0x6f2   : > { %v2886_v21 = vadd.f32 %v3612_v22, %v2798_v30  ;;  %v2792_v32 = vpop.f32.mrb[47].mxu1 }
 0x6f3   : > { %v2884_v24 = vadd.f32 %v2870_v25, %v2790_v9  ;;  %v2793_v34 = vadd.f32 %v2792_v32, %v2720_v12 }
 0x6f4   : > { %v2889_v26 = vadd.f32 %v2886_v21, %v2641_v14 }
 0x6f5   : > { %v2887_v19 = vadd.f32 %v2884_v24, %v2639_v15  ;;  %v2885_v16 = vadd.f32 %v2873_v23, %v2793_v34 }
 0x6f6   : > { %v2899_v37 = vadd.f32 %v3214_v33, %v2889_v26 }
 0x6f7   : > { %v2897_v38 = vadd.f32 %v3214_v33, %v2887_v19  ;;  %v2888_v39 = vadd.f32 %v2885_v16, %v2640_v20 }
 0x6f8   : > { %vm2902_vm0 = vcmp.gt.f32.partialorder %v2899_v37, 0.0  ;;  %v2905_v40 = vmul.f32 0.2, %v2899_v37 }
 0x6f9   : > { %vm2900_vm1 = vcmp.gt.f32.partialorder %v2897_v38, 0.0  ;;  %v2903_v41 = vmul.f32 0.2, %v2897_v38  ;;  %v2898_v42 = vadd.f32 %v3214_v33, %v2888_v39 }
 0x6fa   : > { %v2908_v46 = vsel %vm2902_vm0, %v2899_v37, %v2905_v40 }
 0x6fb   : > { %2911 = vst [vmem:[%s616_s2 + $0x10] sm:$0x3] %v2908_v46  ;;  %v2906_v48 = vsel %vm2900_vm1, %v2897_v38, %v2903_v41  ;;  %vm2901_vm3 = vcmp.gt.f32.partialorder %v2898_v42, 0.0  ;;  %v2904_v49 = vmul.f32 0.2, %v2898_v42 }
 0x6fc   : > { %2909 = vst [vmem:[%s616_s2] sm:$0xff] %v2906_v48 }
 0x6fd   : > { %v2907_v50 = vsel %vm2901_vm3, %v2898_v42, %v2904_v49 }
 0x6fe   : > { %2910 = vst [vmem:[%s616_s2 + $0x8] sm:$0xff] %v2907_v50 }
 0x6ff PF: > { %p29_p10 = scmp.ge.s32.totalorder %s4396_s28, 4   ;;  %s4751_s18 = smov %s4081_s19 }
 0x700   : > { %s4752_s19 = smov %s4085_s20  ;;  %s4753_s20 = smov %s4407_s1 }
 0x701   : > { %s4754_s21 = smov %s4396_s28  ;;  %31 = sbr.rel (!%p29_p10) target bundleno = 16 (0x10), region = 164 }
 0x708   :  { %2933 = vsyncpa [#allocation3], 1 }
 0x709   :  { %2935 = vsyncpa [#allocation3 + $0x1], 1 }
 0x70a   :  { %2936 = vsyncpa [#allocation5], 1 }
 0x70b   :  { %2937 = vsyncpa [#allocation8], 1 }
 0x70c   :  { %2938 = vsyncpa [#allocation11], 1 }
 0x70d   :  { %2939 = vsyncpa [#allocation14], 1 }

</bundles_post_ra>
